<compile_context>
chip_gen: v5e
topology: v5e:2x2
jax: 0.10.0
libtpu: 0.0.40
codegen_flags: <defaults>
</compile_context>

<pallas_src>
import jax
import jax.numpy as jnp
from jax.experimental import pallas as pl
from jax.experimental.pallas import tpu as pltpu

NUM_CLASSES = 10
D_IN = 1024
D_H = 512
LANE = 128


def _round_up(a, m):
    return ((a + m - 1) // m) * m


def mlp_kernel(x_ref, w1_ref, b1_ref, w2_ref, b2_ref, w3_ref, b3_ref, o_ref):
    # x_ref: (TB, 1024) bf16; w1: (1024, 512) bf16; w2: (512, 512) bf16;
    # w3: (512, NC_PAD) bf16; biases f32; o_ref: (TB, NC_PAD) f32.
    x = x_ref[...]
    # Matmuls in bf16 on the MXU, accumulate in f32.
    h1 = jnp.dot(x, w1_ref[...], preferred_element_type=jnp.float32) + b1_ref[...]
    h1 = jnp.maximum(h1, 0.0).astype(jnp.bfloat16)          # f32 ReLU, bf16 for next dot
    h2 = jnp.dot(h1, w2_ref[...], preferred_element_type=jnp.float32) + b2_ref[...]
    h2 = jnp.maximum(h2, 0.0).astype(jnp.bfloat16)
    logits = jnp.dot(h2, w3_ref[...], preferred_element_type=jnp.float32) + b3_ref[...]
    o_ref[...] = logits.astype(o_ref.dtype)


def classifier_forward(x_nchw, params, *, tb=256):
    """x_nchw: [B, C, H, W] with C*H*W == 1024. Returns f32 logits [B, num_classes].

    tb: batch tile. 256 is a good default for v6e/v7x; use 128 on v5e.
    """
    w1, b1, w2, b2, w3, b3 = params
    B = x_nchw.shape[0]
    x_flat = x_nchw.reshape(B, -1)                     # nn.Flatten (row-major)
    assert x_flat.shape[1] == D_IN

    nc = w3.shape[1]
    nc_pad = _round_up(max(nc, LANE), LANE)            # lane-dense output (>=128)

    # Adaptive batch tile: never over-pad a tiny batch, cap at tb.
    tb_eff = min(tb, _round_up(B, 8))
    B_pad = _round_up(B, tb_eff)

    x_p = x_flat if B_pad == B else jnp.pad(x_flat, ((0, B_pad - B), (0, 0)))
    x_bf = x_p.astype(jnp.bfloat16)

    # bf16 weights for the MXU; biases stay f32 (added to the f32 accumulator).
    w1b = w1.astype(jnp.bfloat16)
    w2b = w2.astype(jnp.bfloat16)
    w3b = jnp.pad(w3, ((0, 0), (0, nc_pad - nc))).astype(jnp.bfloat16)
    b3p = jnp.pad(b3, ((0, 0), (0, nc_pad - nc)))      # (1, nc_pad) f32

    grid = (B_pad // tb_eff,)

    out = pl.pallas_call(
        mlp_kernel,
        out_shape=jax.ShapeDtypeStruct((B_pad, nc_pad), jnp.float32),
        grid_spec=pltpu.PrefetchScalarGridSpec(
            num_scalar_prefetch=0,
            grid=grid,
            in_specs=[
                pl.BlockSpec((tb_eff, D_IN), lambda i: (i, 0)),   # x tile
                pl.BlockSpec((D_IN, D_H), lambda i: (0, 0)),      # w1 (resident)
                pl.BlockSpec((1, D_H), lambda i: (0, 0)),         # b1
                pl.BlockSpec((D_H, D_H), lambda i: (0, 0)),       # w2 (resident)
                pl.BlockSpec((1, D_H), lambda i: (0, 0)),         # b2
                pl.BlockSpec((D_H, nc_pad), lambda i: (0, 0)),    # w3 (resident, padded)
                pl.BlockSpec((1, nc_pad), lambda i: (0, 0)),      # b3 (padded)
            ],
            out_specs=pl.BlockSpec((tb_eff, nc_pad), lambda i: (i, 0)),
        ),
        compiler_params=pltpu.CompilerParams(
            dimension_semantics=("parallel",)),
    )(x_bf, w1b, b1, w2b, b2, w3b, b3p)

    return out[:B, :nc]


def init_params(key, num_classes=NUM_CLASSES):
    """Deterministic init mimicking nn.Linear default (U[-1/sqrt(fan_in), +])."""
    def linear_init(k, fan_in, fan_out):
        kw, kb = jax.random.split(k)
        bound = 1.0 / jnp.sqrt(fan_in)
        w = jax.random.uniform(kw, (fan_in, fan_out), jnp.float32, -bound, bound)
        b = jax.random.uniform(kb, (1, fan_out), jnp.float32, -bound, bound)
        return w, b

    k1, k2, k3 = jax.random.split(key, 3)
    w1, b1 = linear_init(k1, D_IN, D_H)
    w2, b2 = linear_init(k2, D_H, D_H)
    w3, b3 = linear_init(k3, D_H, num_classes)
    return (w1, b1, w2, b2, w3, b3)


def reference_forward(x_nchw, params):
    """f32 reference matching the PyTorch module."""
    w1, b1, w2, b2, w3, b3 = params
    x = x_nchw.reshape(x_nchw.shape[0], -1)
    h1 = jnp.maximum(x @ w1 + b1, 0.0)
    h2 = jnp.maximum(h1 @ w2 + b2, 0.0)
    return h2 @ w3 + b3


if __name__ == "__main__":
    key = jax.random.PRNGKey(0)
    kx, kx2, kp = jax.random.split(key, 3)
    params = init_params(kp)

    # Small NCHW input whose flattened feature dim is 1024: 4 * 16 * 16 = 1024.
    B, C, H, W = 8, 4, 16, 16
    x = jax.random.normal(kx, (B, C, H, W), jnp.float32)

    logits = classifier_forward(x, params)
    logits = jax.block_until_ready(logits)
    ref = reference_forward(x, params)
    assert logits.shape == (B, NUM_CLASSES)
    # bf16 matmul inputs with f32 accumulation -> small numeric drift vs f32 ref.
    assert jnp.allclose(logits, ref, atol=5e-2, rtol=5e-2), "mismatch vs reference"

    # Ragged-batch path: B not a multiple of 8, exercises wrapper-side padding.
    B2 = 20
    x2 = jax.random.normal(kx2, (B2, C, H, W), jnp.float32)
    logits2 = jax.block_until_ready(classifier_forward(x2, params))
    ref2 = reference_forward(x2, params)
    assert logits2.shape == (B2, NUM_CLASSES)
    assert jnp.allclose(logits2, ref2, atol=5e-2, rtol=5e-2), "ragged mismatch"

    print("KERNEL_OK")
</pallas_src>

<mosaic_0001>
module attributes {stable_mosaic.version = 11 : i64} {
  func.func @mlp_kernel(%arg0: i32, %arg1: memref<8x1024xbf16, #tpu.memory_space<vmem>>, %arg2: memref<1024x512xbf16, #tpu.memory_space<vmem>>, %arg3: memref<1x512xf32, #tpu.memory_space<vmem>>, %arg4: memref<512x512xbf16, #tpu.memory_space<vmem>>, %arg5: memref<1x512xf32, #tpu.memory_space<vmem>>, %arg6: memref<512x128xbf16, #tpu.memory_space<vmem>>, %arg7: memref<1x128xf32, #tpu.memory_space<vmem>>, %arg8: memref<8x128xf32, #tpu.memory_space<vmem>>) attributes {dimension_semantics = [#tpu.dimension_semantics<parallel>], iteration_bounds = array<i64: 1>, scalar_prefetch = 0 : i64, scratch_operands = 0 : i64, tpu.core_type = #tpu.core_type<tc>, window_params = [{transform_indices = @transform_0, window_bounds = array<i64: 8, 1024>}, {pipeline_mode = #tpu.pipeline_mode<synchronous>, transform_indices = @transform_1, window_bounds = array<i64: 1024, 512>}, {pipeline_mode = #tpu.pipeline_mode<synchronous>, transform_indices = @transform_2, window_bounds = array<i64: 1, 512>}, {pipeline_mode = #tpu.pipeline_mode<synchronous>, transform_indices = @transform_3, window_bounds = array<i64: 512, 512>}, {pipeline_mode = #tpu.pipeline_mode<synchronous>, transform_indices = @transform_4, window_bounds = array<i64: 1, 512>}, {pipeline_mode = #tpu.pipeline_mode<synchronous>, transform_indices = @transform_5, window_bounds = array<i64: 512, 128>}, {pipeline_mode = #tpu.pipeline_mode<synchronous>, transform_indices = @transform_6, window_bounds = array<i64: 1, 128>}, {transform_indices = @transform_7, window_bounds = array<i64: 8, 128>}]} {
    %c0 = arith.constant 0 : index
    %c0_0 = arith.constant 0 : index
    %0 = vector.load %arg1[%c0, %c0_0] : memref<8x1024xbf16, #tpu.memory_space<vmem>>, vector<8x1024xbf16>
    %c0_1 = arith.constant 0 : index
    %c0_2 = arith.constant 0 : index
    %1 = vector.load %arg2[%c0_1, %c0_2] : memref<1024x512xbf16, #tpu.memory_space<vmem>>, vector<1024x512xbf16>
    %cst = arith.constant dense<0.000000e+00> : vector<8x512xf32>
    %2 = tpu.matmul %0, %1, %cst {dimension_numbers = #tpu.dot_dimension_numbers<[1], [0], [0], [1], [0, 0, 1, 1], [], []>} : vector<8x1024xbf16>, vector<1024x512xbf16>, vector<8x512xf32> -> vector<8x512xf32>
    %c0_3 = arith.constant 0 : index
    %c0_4 = arith.constant 0 : index
    %3 = vector.load %arg3[%c0_3, %c0_4] : memref<1x512xf32, #tpu.memory_space<vmem>>, vector<1x512xf32>
    %4 = vector.broadcast %3 : vector<1x512xf32> to vector<8x512xf32>
    %5 = arith.addf %2, %4 : vector<8x512xf32>
    %cst_5 = arith.constant 0.000000e+00 : f32
    %6 = vector.broadcast %cst_5 : f32 to vector<8x512xf32>
    %7 = arith.maximumf %5, %6 : vector<8x512xf32>
    %8 = arith.truncf %7 : vector<8x512xf32> to vector<8x512xbf16>
    %c0_6 = arith.constant 0 : index
    %c0_7 = arith.constant 0 : index
    %9 = vector.load %arg4[%c0_6, %c0_7] : memref<512x512xbf16, #tpu.memory_space<vmem>>, vector<512x512xbf16>
    %cst_8 = arith.constant dense<0.000000e+00> : vector<8x512xf32>
    %10 = tpu.matmul %8, %9, %cst_8 {dimension_numbers = #tpu.dot_dimension_numbers<[1], [0], [0], [1], [0, 0, 1, 1], [], []>} : vector<8x512xbf16>, vector<512x512xbf16>, vector<8x512xf32> -> vector<8x512xf32>
    %c0_9 = arith.constant 0 : index
    %c0_10 = arith.constant 0 : index
    %11 = vector.load %arg5[%c0_9, %c0_10] : memref<1x512xf32, #tpu.memory_space<vmem>>, vector<1x512xf32>
    %12 = vector.broadcast %11 : vector<1x512xf32> to vector<8x512xf32>
    %13 = arith.addf %10, %12 : vector<8x512xf32>
    %cst_11 = arith.constant 0.000000e+00 : f32
    %14 = vector.broadcast %cst_11 : f32 to vector<8x512xf32>
    %15 = arith.maximumf %13, %14 : vector<8x512xf32>
    %16 = arith.truncf %15 : vector<8x512xf32> to vector<8x512xbf16>
    %c0_12 = arith.constant 0 : index
    %c0_13 = arith.constant 0 : index
    %17 = vector.load %arg6[%c0_12, %c0_13] : memref<512x128xbf16, #tpu.memory_space<vmem>>, vector<512x128xbf16>
    %cst_14 = arith.constant dense<0.000000e+00> : vector<8x128xf32>
    %18 = tpu.matmul %16, %17, %cst_14 {dimension_numbers = #tpu.dot_dimension_numbers<[1], [0], [0], [1], [0, 0, 1, 1], [], []>} : vector<8x512xbf16>, vector<512x128xbf16>, vector<8x128xf32> -> vector<8x128xf32>
    %c0_15 = arith.constant 0 : index
    %c0_16 = arith.constant 0 : index
    %19 = vector.load %arg7[%c0_15, %c0_16] : memref<1x128xf32, #tpu.memory_space<vmem>>, vector<1x128xf32>
    %20 = vector.broadcast %19 : vector<1x128xf32> to vector<8x128xf32>
    %21 = arith.addf %18, %20 : vector<8x128xf32>
    %c0_17 = arith.constant 0 : index
    %c0_18 = arith.constant 0 : index
    %22 = vector.load %arg8[%c0_17, %c0_18] : memref<8x128xf32, #tpu.memory_space<vmem>>, vector<8x128xf32>
    tpu.vector_store %arg8[%c0_17, %c0_18], %21 {strides = array<i32>} : memref<8x128xf32, #tpu.memory_space<vmem>>, vector<8x128xf32>,
    return
  }
  func.func @transform_0(%arg0: i32) -> (i32, i32) {
    %c0_i32 = arith.constant 0 : i32
    %c0_i32_0 = arith.constant 0 : i32
    return %arg0, %c0_i32 : i32, i32
  }
  func.func @transform_1(%arg0: i32) -> (i32, i32) {
    %c0_i32 = arith.constant 0 : i32
    %c0_i32_0 = arith.constant 0 : i32
    %c0_i32_1 = arith.constant 0 : i32
    return %c0_i32, %c0_i32_0 : i32, i32
  }
  func.func @transform_2(%arg0: i32) -> (i32, i32) {
    %c0_i32 = arith.constant 0 : i32
    %c0_i32_0 = arith.constant 0 : i32
    %c0_i32_1 = arith.constant 0 : i32
    return %c0_i32, %c0_i32_0 : i32, i32
  }
  func.func @transform_3(%arg0: i32) -> (i32, i32) {
    %c0_i32 = arith.constant 0 : i32
    %c0_i32_0 = arith.constant 0 : i32
    %c0_i32_1 = arith.constant 0 : i32
    return %c0_i32, %c0_i32_0 : i32, i32
  }
  func.func @transform_4(%arg0: i32) -> (i32, i32) {
    %c0_i32 = arith.constant 0 : i32
    %c0_i32_0 = arith.constant 0 : i32
    %c0_i32_1 = arith.constant 0 : i32
    return %c0_i32, %c0_i32_0 : i32, i32
  }
  func.func @transform_5(%arg0: i32) -> (i32, i32) {
    %c0_i32 = arith.constant 0 : i32
    %c0_i32_0 = arith.constant 0 : i32
    %c0_i32_1 = arith.constant 0 : i32
    return %c0_i32, %c0_i32_0 : i32, i32
  }
  func.func @transform_6(%arg0: i32) -> (i32, i32) {
    %c0_i32 = arith.constant 0 : i32
    %c0_i32_0 = arith.constant 0 : i32
    %c0_i32_1 = arith.constant 0 : i32
    return %c0_i32, %c0_i32_0 : i32, i32
  }
  func.func @transform_7(%arg0: i32) -> (i32, i32) {
    %c0_i32 = arith.constant 0 : i32
    %c0_i32_0 = arith.constant 0 : i32
    return %arg0, %c0_i32 : i32, i32
  }
}

</mosaic_0001>

<bundles_post_ra>
// kernel: tpu_custom_call.1
= control target key start
LH: loop header
LB: loop body
LE: loop exit
PB: predicated region body
PF: predicated region fallthrough
CT: control target
= control target key end

     0   :  { %12 = vsyncpa [#allocation3], 0  ;;  %s5930_s0 = inlined_call_operand.hbm [shape: bf16[8,1024], index: 0, kind: input, shape index: {}]   ;;  %s5931_s1 = inlined_call_operand.hbm [shape: bf16[1024,512], index: 1, kind: input, shape index: {}]   ;;  %s5932_s2 = inlined_call_operand.hbm [shape: f32[1,512], index: 2, kind: input, shape index: {}]   ;;  %s5933_s3 = inlined_call_operand.hbm [shape: bf16[512,512], index: 3, kind: input, shape index: {}]   ;;  %s5934_s4 = inlined_call_operand.hbm [shape: f32[1,512], index: 4, kind: input, shape index: {}]   ;;  %s5935_s5 = inlined_call_operand.hbm [shape: bf16[512,128], index: 5, kind: input, shape index: {}]   ;;  %s5936_s6 = inlined_call_operand.vmem [shape: f32[1,128], index: 6, kind: input, shape index: {}]   ;;  %s5937_s7 = inlined_call_operand.hbm [shape: f32[8,128], index: 7, kind: output, shape index: {}]  }
   0x1   :  { %13 = vsyncpa [#allocation6], 0 }
   0x2   :  { %14 = vsyncpa [#allocation9], 0 }
   0x3   :  { %15 = vsyncpa [#allocation12], 0  ;;  %s32_s26 = sshll.u32 %s5931_s1, 4  ;;  %s33_s26 = int_to_ptr.hbm [resolvable:$true] %s32_s26 }
   0x4   :  { %16 = vsyncpa [#allocation4], 0  ;;  %s5715_s27 = smov [#allocation5]   ;;  %s56_s8 = sshll.u32 %s5933_s3, 4  ;;  %s57_s8 = int_to_ptr.hbm [resolvable:$true] %s56_s8 }
   0x5   :  { %s34_s28 = sshll.u32 %s5715_s27, 4  ;;  %s5716_s9 = smov 256   ;;  %s35_s28 = int_to_ptr.vmem [resolvable:$true] %s34_s28 }
   0x6   :  { %s5717_s10 = smov 16   ;;  %s5718_s11 = smov [#allocation8]  }
   0x7   :  { %40 = dma.hbm_to_vmem [thread:$0]  %s33_s26, 32768, %s35_s28, [#allocation6], %s5716_s9, %s5716_s9, %s5717_s10  }
   0x8   :  { %s58_s12 = sshll.u32 %s5718_s11, 4  ;;  %s22_s15 = sshll.u32 %s5930_s0, 4  ;;  %s59_s12 = int_to_ptr.vmem [resolvable:$true] %s58_s12  ;;  %s23_s15 = int_to_ptr.hbm [resolvable:$true] %s22_s15 }
   0x9   :  { %64 = dma.hbm_to_vmem [thread:$0]  %s57_s8, 16384, %s59_s12, [#allocation9], %s5716_s9, %s5716_s9, %s5717_s10  }
   0xa   :  { %s46_s17 = sshll.u32 %s5932_s2, 4  ;;  %s5719_s18 = smov [#allocation2]   ;;  %s47_s17 = int_to_ptr.hbm [resolvable:$true] %s46_s17 }
   0xb   :  { %s24_s19 = sshll.u32 %s5719_s18, 4  ;;  %s5720_s3 = smov [#allocation7]   ;;  %s25_s19 = int_to_ptr.vmem [resolvable:$true] %s24_s19 }
   0xc   :  { %27 = dma.hbm_to_vmem [thread:$0]  %s23_s15, 512, %s25_s19, [#allocation3]  }
   0xd   :  { %s48_s20 = sshll.u32 %s5720_s3, 4  ;;  %s70_s23 = sshll.u32 %s5934_s4, 4  ;;  %s49_s20 = int_to_ptr.vmem [resolvable:$true] %s48_s20  ;;  %s71_s23 = int_to_ptr.hbm [resolvable:$true] %s70_s23 }
   0xe   :  { %51 = dma.hbm_to_vmem [thread:$0]  %s47_s17, 64, %s49_s20, [#allocation6]  }
   0xf   :  { %s80_s25 = sshll.u32 %s5935_s5, 4  ;;  %s5721_s26 = smov [#allocation10]   ;;  %s81_s25 = int_to_ptr.hbm [resolvable:$true] %s80_s25 }
  0x10   :  { %s72_s2 = sshll.u32 %s5721_s26, 4  ;;  %s5722_s27 = smov [#allocation11]   ;;  %s73_s2 = int_to_ptr.vmem [resolvable:$true] %s72_s2 }
  0x11   :  { %75 = dma.hbm_to_vmem [thread:$0]  %s71_s23, 64, %s73_s2, [#allocation9]  }
  0x12   :  { %s82_s28 = sshll.u32 %s5722_s27, 4  ;;  %s5723_s29 = smov 64   ;;  %s83_s28 = int_to_ptr.vmem [resolvable:$true] %s82_s28 }
  0x13   :  { %s5724_s30 = smov 4  }
  0x14   :  { %88 = dma.hbm_to_vmem [thread:$0]  %s81_s25, 4096, %s83_s28, [#allocation12], %s5723_s29, %s5723_s29, %s5724_s30  }
  0x15   :  { %5705 = dma.done.wait [#allocation3], 512  }
  0x16   :  { %5706 = vsyncadd [#allocation3], 4294966784 }
  0x17   :  { %5707 = dma.done.wait [#allocation6], 32832  }
  0x18   :  { %5708 = vsyncadd [#allocation6], 4294934464 }
  0x19   :  { %5709 = dma.done.wait [#allocation9], 16448  }
  0x1a   :  { %5710 = vsyncadd [#allocation9], 4294950848 }
  0x1b   :  { %5711 = dma.done.wait [#allocation12], 4096  }
  0x1c   :  { %5712 = vsyncadd [#allocation12], 4294963200  ;;  %v3558_v0 = vld [vmem:[#allocation5 + $0xe0] sm:$0xf]  ;;  %v5138_v1 = vld [vmem:[#allocation5 + $0xec] sm:$0xf0] }
  0x1d   :  { %v3686_v2 = vld [vmem:[#allocation5 + $0x1e0] sm:$0xf]  ;;  %v3559_v3 = vor.u32 %v5138_v1, %v3558_v0  ;;  %v5170_v4 = vld [vmem:[#allocation5 + $0x1ec] sm:$0xf0]  ;;  %s5725_s8 = smov [#allocation13]   ;;  %s3431_s12 = sshll.u32 %s5937_s7, 4  ;;  %s3432_s12 = int_to_ptr.hbm [resolvable:$true] %s3431_s12 }
  0x1e   :  { %v3814_v5 = vld [vmem:[#allocation5 + $0x2e0] sm:$0xf]  ;;  %v5202_v6 = vld [vmem:[#allocation5 + $0x2ec] sm:$0xf0]  ;;  %v3687_v7 = vor.u32 %v5170_v4, %v3686_v2  ;;  %s3429_s9 = sshll.u32 %s5725_s8, 4  ;;  %s3430_s9 = int_to_ptr.vmem [resolvable:$true] %s3429_s9 }
  0x1f   :  { %v3815_v8 = vor.u32 %v5202_v6, %v3814_v5  ;;  %v3942_v9 = vld [vmem:[#allocation5 + $0x3e0] sm:$0xf]  ;;  %v5234_v10 = vld [vmem:[#allocation5 + $0x3ec] sm:$0xf0]  ;;  %1693 = vmatpush.bf16.msra.mxu0 %v3559_v3 }
  0x20   :  { %v3542_v11 = vld [vmem:[#allocation5 + $0xc0] sm:$0xf]  ;;  %v3943_v12 = vor.u32 %v5234_v10, %v3942_v9  ;;  %v5134_v13 = vld [vmem:[#allocation5 + $0xcc] sm:$0xf0]  ;;  %1706 = vmatpush.bf16.msra.mxu1 %v3687_v7 }
  0x21   :  { %v3670_v14 = vld [vmem:[#allocation5 + $0x1c0] sm:$0xf]  ;;  %v5166_v15 = vld [vmem:[#allocation5 + $0x1cc] sm:$0xf0]  ;;  %1719 = vmatpush.bf16.msra.mxu2 %v3815_v8  ;;  %v3543_v16 = vor.u32 %v5134_v13, %v3542_v11 }
  0x22   :  { %v3671_v17 = vor.u32 %v5166_v15, %v3670_v14  ;;  %v3798_v18 = vld [vmem:[#allocation5 + $0x2c0] sm:$0xf]  ;;  %v5198_v19 = vld [vmem:[#allocation5 + $0x2cc] sm:$0xf0]  ;;  %1732 = vmatpush.bf16.msra.mxu3 %v3943_v12 }
  0x23   :  { %v3926_v20 = vld [vmem:[#allocation5 + $0x3c0] sm:$0xf]  ;;  %v3799_v21 = vor.u32 %v5198_v19, %v3798_v18  ;;  %v5230_v22 = vld [vmem:[#allocation5 + $0x3cc] sm:$0xf0]  ;;  %1694 = vmatpush.bf16.msra.mxu0 %v3543_v16 }
  0x24   :  { %v3526_v23 = vld [vmem:[#allocation5 + $0xa0] sm:$0xf]  ;;  %v5130_v24 = vld [vmem:[#allocation5 + $0xac] sm:$0xf0]  ;;  %v3927_v25 = vor.u32 %v5230_v22, %v3926_v20  ;;  %1707 = vmatpush.bf16.msra.mxu1 %v3671_v17 }
  0x25   :  { %v3654_v26 = vld [vmem:[#allocation5 + $0x1a0] sm:$0xf]  ;;  %v5162_v27 = vld [vmem:[#allocation5 + $0x1ac] sm:$0xf0]  ;;  %v3527_v29 = vor.u32 %v5130_v24, %v3526_v23  ;;  %1720 = vmatpush.bf16.msra.mxu2 %v3799_v21 }
  0x26   :  { %v3782_v28 = vld [vmem:[#allocation5 + $0x2a0] sm:$0xf]  ;;  %v5194_v30 = vld [vmem:[#allocation5 + $0x2ac] sm:$0xf0]  ;;  %v3655_v33 = vor.u32 %v5162_v27, %v3654_v26  ;;  %1733 = vmatpush.bf16.msra.mxu3 %v3927_v25 }
  0x27   :  { %v3910_v31 = vld [vmem:[#allocation5 + $0x3a0] sm:$0xf]  ;;  %v5226_v32 = vld [vmem:[#allocation5 + $0x3ac] sm:$0xf0]  ;;  %v3783_v34 = vor.u32 %v5194_v30, %v3782_v28  ;;  %1695 = vmatpush.bf16.msra.mxu0 %v3527_v29 }
  0x28   :  { %v3510_v35 = vld [vmem:[#allocation5 + $0x80] sm:$0xf]  ;;  %v5126_v36 = vld [vmem:[#allocation5 + $0x8c] sm:$0xf0]  ;;  %v3911_v38 = vor.u32 %v5226_v32, %v3910_v31  ;;  %1708 = vmatpush.bf16.msra.mxu1 %v3655_v33 }
  0x29   :  { %v3638_v37 = vld [vmem:[#allocation5 + $0x180] sm:$0xf]  ;;  %v5158_v39 = vld [vmem:[#allocation5 + $0x18c] sm:$0xf0]  ;;  %v3511_v44 = vor.u32 %v5126_v36, %v3510_v35  ;;  %1721 = vmatpush.bf16.msra.mxu2 %v3783_v34 }
  0x2a   :  { %v3766_v40 = vld [vmem:[#allocation5 + $0x280] sm:$0xf]  ;;  %v5190_v41 = vld [vmem:[#allocation5 + $0x28c] sm:$0xf0]  ;;  %v3639_v45 = vor.u32 %v5158_v39, %v3638_v37  ;;  %1734 = vmatpush.bf16.msra.mxu3 %v3911_v38 }
  0x2b   :  { %v3894_v42 = vld [vmem:[#allocation5 + $0x380] sm:$0xf]  ;;  %v5222_v43 = vld [vmem:[#allocation5 + $0x38c] sm:$0xf0]  ;;  %v3767_v46 = vor.u32 %v5190_v41, %v3766_v40  ;;  %1696 = vmatpush.bf16.msra.mxu0 %v3511_v44 }
  0x2c   :  { %v3494_v47 = vld [vmem:[#allocation5 + $0x60] sm:$0xf]  ;;  %v5122_v48 = vld [vmem:[#allocation5 + $0x6c] sm:$0xf0]  ;;  %v3895_v50 = vor.u32 %v5222_v43, %v3894_v42  ;;  %1709 = vmatpush.bf16.msra.mxu1 %v3639_v45 }
  0x2d   :  { %v3622_v49 = vld [vmem:[#allocation5 + $0x160] sm:$0xf]  ;;  %v5154_v51 = vld [vmem:[#allocation5 + $0x16c] sm:$0xf0]  ;;  %v3495_v56 = vor.u32 %v5122_v48, %v3494_v47  ;;  %1722 = vmatpush.bf16.msra.mxu2 %v3767_v46 }
  0x2e   :  { %v3750_v52 = vld [vmem:[#allocation5 + $0x260] sm:$0xf]  ;;  %v5186_v53 = vld [vmem:[#allocation5 + $0x26c] sm:$0xf0]  ;;  %v3623_v57 = vor.u32 %v5154_v51, %v3622_v49  ;;  %1735 = vmatpush.bf16.msra.mxu3 %v3895_v50 }
  0x2f   :  { %v3878_v54 = vld [vmem:[#allocation5 + $0x360] sm:$0xf]  ;;  %v5218_v55 = vld [vmem:[#allocation5 + $0x36c] sm:$0xf0]  ;;  %v3751_v58 = vor.u32 %v5186_v53, %v3750_v52  ;;  %1697 = vmatpush.bf16.msra.mxu0 %v3495_v56 }
  0x30   :  { %v3478_v59 = vld [vmem:[#allocation5 + $0x40] sm:$0xf]  ;;  %v5118_v60 = vld [vmem:[#allocation5 + $0x4c] sm:$0xf0]  ;;  %v3879_v62 = vor.u32 %v5218_v55, %v3878_v54  ;;  %1710 = vmatpush.bf16.msra.mxu1 %v3623_v57 }
  0x31   :  { %v3606_v61 = vld [vmem:[#allocation5 + $0x140] sm:$0xf]  ;;  %v5150_v63 = vld [vmem:[#allocation5 + $0x14c] sm:$0xf0]  ;;  %v3479_v4 = vor.u32 %v5118_v60, %v3478_v59  ;;  %1723 = vmatpush.bf16.msra.mxu2 %v3751_v58 }
  0x32   :  { %v3734_v0 = vld [vmem:[#allocation5 + $0x240] sm:$0xf]  ;;  %v5182_v1 = vld [vmem:[#allocation5 + $0x24c] sm:$0xf0]  ;;  %v3607_v5 = vor.u32 %v5150_v63, %v3606_v61  ;;  %1736 = vmatpush.bf16.msra.mxu3 %v3879_v62 }
  0x33   :  { %v3862_v2 = vld [vmem:[#allocation5 + $0x340] sm:$0xf]  ;;  %v5214_v3 = vld [vmem:[#allocation5 + $0x34c] sm:$0xf0]  ;;  %v3735_v6 = vor.u32 %v5182_v1, %v3734_v0  ;;  %1698 = vmatpush.bf16.msra.mxu0 %v3479_v4 }
  0x34   :  { %v3462_v7 = vld [vmem:[#allocation5 + $0x20] sm:$0xf]  ;;  %v5114_v8 = vld [vmem:[#allocation5 + $0x2c] sm:$0xf0]  ;;  %v3863_v10 = vor.u32 %v5214_v3, %v3862_v2  ;;  %1711 = vmatpush.bf16.msra.mxu1 %v3607_v5  ;;  %v116_v2 = vld [vmem:[#allocation2 + $0x8] sm:$0xff] }
  0x35   :  { %v3590_v9 = vld [vmem:[#allocation5 + $0x120] sm:$0xf]  ;;  %v5146_v11 = vld [vmem:[#allocation5 + $0x12c] sm:$0xf0]  ;;  %v3463_v16 = vor.u32 %v5114_v8, %v3462_v7  ;;  %1724 = vmatpush.bf16.msra.mxu2 %v3735_v6  ;;  %v391_v8 = vunpack.c.l.b16 %v116_v2 }
  0x36   :  { %v3718_v12 = vld [vmem:[#allocation5 + $0x220] sm:$0xf]  ;;  %v5178_v13 = vld [vmem:[#allocation5 + $0x22c] sm:$0xf0]  ;;  %v3591_v19 = vor.u32 %v5146_v11, %v3590_v9  ;;  %1737 = vmatpush.bf16.msra.mxu3 %v3863_v10  ;;  %v392_v10 = vunpack.c.h.b16 %v116_v2 }
  0x37   :  { %v3846_v14 = vld [vmem:[#allocation5 + $0x320] sm:$0xf]  ;;  %v5210_v15 = vld [vmem:[#allocation5 + $0x32c] sm:$0xf0]  ;;  %v3719_v20 = vor.u32 %v5178_v13, %v3718_v12  ;;  %1699 = vmatpush.bf16.msra.mxu0 %v3463_v16 }
  0x38   :  { %v3446_v17 = vld [vmem:[#allocation5] sm:$0xf]  ;;  %v5110_v18 = vld [vmem:[#allocation5 + $0xc] sm:$0xf0]  ;;  %v3847_v24 = vor.u32 %v5210_v15, %v3846_v14  ;;  %1712 = vmatpush.bf16.msra.mxu1 %v3591_v19 }
  0x39   :  { %v3574_v21 = vld [vmem:[#allocation5 + $0x100] sm:$0xf]  ;;  %v5142_v22 = vld [vmem:[#allocation5 + $0x10c] sm:$0xf0]  ;;  %v3447_v31 = vor.u32 %v5110_v18, %v3446_v17  ;;  %1725 = vmatpush.bf16.msra.mxu2 %v3719_v20  ;;  %v5784_v18 = vpack.c.b16 %v391_v8, %v391_v8  ;;  %v5788_v20 = vpack.c.b16 %v392_v10, %v392_v10  ;;  %v5136_v8 = vld [vmem:[#allocation5 + $0xe4] sm:$0xf] }
  0x3a   :  { %v3702_v23 = vld [vmem:[#allocation5 + $0x200] sm:$0xf]  ;;  %v5174_v25 = vld [vmem:[#allocation5 + $0x20c] sm:$0xf0]  ;;  %v3575_v35 = vor.u32 %v5142_v22, %v3574_v21  ;;  %1738 = vmatpush.bf16.msra.mxu3 %v3847_v24  ;;  %v5168_v10 = vld [vmem:[#allocation5 + $0x1e4] sm:$0xf] }
  0x3b   :  { %v3830_v26 = vld [vmem:[#allocation5 + $0x300] sm:$0xf]  ;;  %v5206_v27 = vld [vmem:[#allocation5 + $0x30c] sm:$0xf0]  ;;  %v3703_v36 = vor.u32 %v5174_v25, %v3702_v23  ;;  %1700 = vmatpush.bf16.msra.mxu0 %v3447_v31 }
  0x3c   :  { %v4070_v28 = vld [vmem:[#allocation5 + $0x4e0] sm:$0xf]  ;;  %v5266_v29 = vld [vmem:[#allocation5 + $0x4ec] sm:$0xf0]  ;;  %v3831_v39 = vor.u32 %v5206_v27, %v3830_v26  ;;  %1713 = vmatpush.bf16.msra.mxu1 %v3575_v35 }
  0x3d   :  { %v4198_v30 = vld [vmem:[#allocation5 + $0x5e0] sm:$0xf]  ;;  %v5298_v32 = vld [vmem:[#allocation5 + $0x5ec] sm:$0xf0]  ;;  %v4071_v40 = vor.u32 %v5266_v29, %v4070_v28  ;;  %1726 = vmatpush.bf16.msra.mxu2 %v3703_v36 }
  0x3e   :  { %v4326_v33 = vld [vmem:[#allocation5 + $0x6e0] sm:$0xf]  ;;  %v5330_v34 = vld [vmem:[#allocation5 + $0x6ec] sm:$0xf0]  ;;  %v4199_v41 = vor.u32 %v5298_v32, %v4198_v30  ;;  %1739 = vmatpush.bf16.msra.mxu3 %v3831_v39 }
  0x3f   :  { %v4454_v37 = vld [vmem:[#allocation5 + $0x7e0] sm:$0xf]  ;;  %v5362_v38 = vld [vmem:[#allocation5 + $0x7ec] sm:$0xf0]  ;;  %v4327_v42 = vor.u32 %v5330_v34, %v4326_v33  ;;  %1745 = vmatpush.bf16.msrb.mxu0 %v4071_v40 }
  0x40   :  { %v4054_v43 = vld [vmem:[#allocation5 + $0x4c0] sm:$0xf]  ;;  %v5262_v44 = vld [vmem:[#allocation5 + $0x4cc] sm:$0xf0]  ;;  %v4455_v46 = vor.u32 %v5362_v38, %v4454_v37  ;;  %1758 = vmatpush.bf16.msrb.mxu1 %v4199_v41  ;;  %1727 = vmatmul.bf16.vlgmr.msra.gmra.mxu2 %v5784_v18 }
  0x41   :  { %v4182_v45 = vld [vmem:[#allocation5 + $0x5c0] sm:$0xf]  ;;  %v5294_v47 = vld [vmem:[#allocation5 + $0x5cc] sm:$0xf0]  ;;  %v4055_v52 = vor.u32 %v5262_v44, %v4054_v43  ;;  %1771 = vmatpush.bf16.msrb.mxu2 %v4327_v42  ;;  %1740 = vmatmul.bf16.vlgmr.msra.gmra.mxu3 %v5788_v20 }
  0x42   :  { %v4310_v48 = vld [vmem:[#allocation5 + $0x6c0] sm:$0xf]  ;;  %v5326_v49 = vld [vmem:[#allocation5 + $0x6cc] sm:$0xf0]  ;;  %v4183_v54 = vor.u32 %v5294_v47, %v4182_v45  ;;  %1784 = vmatpush.bf16.msrb.mxu3 %v4455_v46 }
  0x43   :  { %v4438_v50 = vld [vmem:[#allocation5 + $0x7c0] sm:$0xf]  ;;  %v5358_v51 = vld [vmem:[#allocation5 + $0x7cc] sm:$0xf0]  ;;  %v4311_v55 = vor.u32 %v5326_v49, %v4310_v48  ;;  %1746 = vmatpush.bf16.msrb.mxu0 %v4055_v52 }
  0x44   :  { %v4038_v53 = vld [vmem:[#allocation5 + $0x4a0] sm:$0xf]  ;;  %v5258_v56 = vld [vmem:[#allocation5 + $0x4ac] sm:$0xf0]  ;;  %v4439_v59 = vor.u32 %v5358_v51, %v4438_v50  ;;  %1759 = vmatpush.bf16.msrb.mxu1 %v4183_v54 }
  0x45   :  { %v4166_v57 = vld [vmem:[#allocation5 + $0x5a0] sm:$0xf]  ;;  %v5290_v58 = vld [vmem:[#allocation5 + $0x5ac] sm:$0xf0]  ;;  %v4039_v0 = vor.u32 %v5258_v56, %v4038_v53  ;;  %1772 = vmatpush.bf16.msrb.mxu2 %v4311_v55 }
  0x46   :  { %v4294_v60 = vld [vmem:[#allocation5 + $0x6a0] sm:$0xf]  ;;  %v5322_v61 = vld [vmem:[#allocation5 + $0x6ac] sm:$0xf0]  ;;  %v4167_v1 = vor.u32 %v5290_v58, %v4166_v57  ;;  %1785 = vmatpush.bf16.msrb.mxu3 %v4439_v59 }
  0x47   :  { %v4422_v62 = vld [vmem:[#allocation5 + $0x7a0] sm:$0xf]  ;;  %v5354_v63 = vld [vmem:[#allocation5 + $0x7ac] sm:$0xf0]  ;;  %v4295_v4 = vor.u32 %v5322_v61, %v4294_v60  ;;  %1747 = vmatpush.bf16.msrb.mxu0 %v4039_v0 }
  0x48   :  { %v115_v3 = vld [vmem:[#allocation2] sm:$0xff]  ;;  %v5254_v6 = vld [vmem:[#allocation5 + $0x48c] sm:$0xf0]  ;;  %v4423_v11 = vor.u32 %v5354_v63, %v4422_v62  ;;  %1760 = vmatpush.bf16.msrb.mxu1 %v4167_v1 }
  0x49   :  { %v4022_v5 = vld [vmem:[#allocation5 + $0x480] sm:$0xf]  ;;  %v389_v9 = vunpack.c.l.b16 %v115_v3  ;;  %v5286_v12 = vld [vmem:[#allocation5 + $0x58c] sm:$0xf0]  ;;  %v390_v15 = vunpack.c.h.b16 %v115_v3  ;;  %1773 = vmatpush.bf16.msrb.mxu2 %v4295_v4  ;;  %v118_v3 = vld [vmem:[#allocation2 + $0x18] sm:$0xff] }
  0x4a   :  { %v4150_v7 = vld [vmem:[#allocation5 + $0x580] sm:$0xf]  ;;  %v5318_v14 = vld [vmem:[#allocation5 + $0x68c] sm:$0xf0]  ;;  %v4023_v21 = vor.u32 %v5254_v6, %v4022_v5  ;;  %1786 = vmatpush.bf16.msrb.mxu3 %v4423_v11 }
  0x4b   :  { %v4278_v13 = vld [vmem:[#allocation5 + $0x680] sm:$0xf]  ;;  %v5350_v17 = vld [vmem:[#allocation5 + $0x78c] sm:$0xf0]  ;;  %v5786_v19 = vpack.c.b16 %v389_v9, %v389_v9  ;;  %v5790_v22 = vpack.c.b16 %v390_v15, %v390_v15  ;;  %v4151_v23 = vor.u32 %v5286_v12, %v4150_v7  ;;  %v3560_v9 = vld [vmem:[#allocation5 + $0xf0] sm:$0xf0]  ;;  %v395_v15 = vunpack.c.l.b16 %v118_v3 }
  0x4c   :  { %v4406_v16 = vld [vmem:[#allocation5 + $0x780] sm:$0xf]  ;;  %v4279_v24 = vor.u32 %v5318_v14, %v4278_v13  ;;  %v5250_v26 = vld [vmem:[#allocation5 + $0x46c] sm:$0xf0]  ;;  %1748 = vmatpush.bf16.msrb.mxu0 %v4023_v21  ;;  %v3688_v12 = vld [vmem:[#allocation5 + $0x1f0] sm:$0xf0] }
  0x4d   :  { %v4006_v25 = vld [vmem:[#allocation5 + $0x460] sm:$0xf]  ;;  %v4407_v28 = vor.u32 %v5350_v17, %v4406_v16  ;;  %v5282_v29 = vld [vmem:[#allocation5 + $0x56c] sm:$0xf0]  ;;  %1701 = vmatmul.bf16.vlgmr.msra.gmra.mxu0 %v5786_v19  ;;  %1714 = vmatmul.bf16.vlgmr.msra.gmra.mxu1 %v5790_v22  ;;  %v5200_v13 = vld [vmem:[#allocation5 + $0x2e4] sm:$0xf] }
  0x4e   :  { %v4134_v27 = vld [vmem:[#allocation5 + $0x560] sm:$0xf]  ;;  %v5314_v31 = vld [vmem:[#allocation5 + $0x66c] sm:$0xf0]  ;;  %v4007_v34 = vor.u32 %v5250_v26, %v4006_v25  ;;  %1761 = vmatpush.bf16.msrb.mxu1 %v4151_v23  ;;  %1774 = vmatpush.bf16.msrb.mxu2 %v4279_v24  ;;  %v3816_v14 = vld [vmem:[#allocation5 + $0x2f0] sm:$0xf0]  ;;  %v396_v25 = vunpack.c.h.b16 %v118_v3 }
  0x4f   :  { %v4262_v30 = vld [vmem:[#allocation5 + $0x660] sm:$0xf]  ;;  %v5346_v33 = vld [vmem:[#allocation5 + $0x76c] sm:$0xf0]  ;;  %v4135_v35 = vor.u32 %v5282_v29, %v4134_v27  ;;  %1787 = vmatpush.bf16.msrb.mxu3 %v4407_v28  ;;  %v5232_v21 = vld [vmem:[#allocation5 + $0x3e4] sm:$0xf]  ;;  %v3563_v27 = vor.u32 %v5136_v8, %v3560_v9  ;;  %v3691_v29 = vor.u32 %v5168_v10, %v3688_v12 }
  0x50   :  { %v4390_v32 = vld [vmem:[#allocation5 + $0x760] sm:$0xf]  ;;  %v4263_v36 = vor.u32 %v5314_v31, %v4262_v30  ;;  %v5246_v38 = vld [vmem:[#allocation5 + $0x44c] sm:$0xf0]  ;;  %1749 = vmatpush.bf16.msrb.mxu0 %v4007_v34  ;;  %v3944_v23 = vld [vmem:[#allocation5 + $0x3f0] sm:$0xf0]  ;;  %v3819_v30 = vor.u32 %v5200_v13, %v3816_v14 }
  0x51   :  { %v3990_v37 = vld [vmem:[#allocation5 + $0x440] sm:$0xf]  ;;  %v4391_v40 = vor.u32 %v5346_v33, %v4390_v32  ;;  %v5278_v41 = vld [vmem:[#allocation5 + $0x54c] sm:$0xf0]  ;;  %v5132_v31 = vld [vmem:[#allocation5 + $0xc4] sm:$0xf]  ;;  %v3947_v34 = vor.u32 %v5232_v21, %v3944_v23 }
  0x52   :  { %v4118_v39 = vld [vmem:[#allocation5 + $0x540] sm:$0xf]  ;;  %v5310_v43 = vld [vmem:[#allocation5 + $0x64c] sm:$0xf0]  ;;  %v3991_v46 = vor.u32 %v5246_v38, %v3990_v37  ;;  %1762 = vmatpush.bf16.msrb.mxu1 %v4135_v35  ;;  %1775 = vmatpush.bf16.msrb.mxu2 %v4263_v36  ;;  %v3544_v32 = vld [vmem:[#allocation5 + $0xd0] sm:$0xf0]  ;;  %v5796_v38 = vpack.c.b16 %v395_v15, %v395_v15 }
  0x53   :  { %v4246_v42 = vld [vmem:[#allocation5 + $0x640] sm:$0xf]  ;;  %v5342_v45 = vld [vmem:[#allocation5 + $0x74c] sm:$0xf0]  ;;  %v4119_v47 = vor.u32 %v5278_v41, %v4118_v39  ;;  %1788 = vmatpush.bf16.msrb.mxu3 %v4391_v40  ;;  %v5164_v33 = vld [vmem:[#allocation5 + $0x1c4] sm:$0xf] }
  0x54   :  { %v4374_v44 = vld [vmem:[#allocation5 + $0x740] sm:$0xf]  ;;  %v4247_v48 = vor.u32 %v5310_v43, %v4246_v42  ;;  %v5242_v50 = vld [vmem:[#allocation5 + $0x42c] sm:$0xf0]  ;;  %1750 = vmatpush.bf16.msrb.mxu0 %v3991_v46  ;;  %v3672_v35 = vld [vmem:[#allocation5 + $0x1d0] sm:$0xf0]  ;;  %v5800_v42 = vpack.c.b16 %v396_v25, %v396_v25  ;;  %v3547_v43 = vor.u32 %v5132_v31, %v3544_v32 }
  0x55   :  { %v3974_v49 = vld [vmem:[#allocation5 + $0x420] sm:$0xf]  ;;  %v4375_v52 = vor.u32 %v5342_v45, %v4374_v44  ;;  %v5274_v53 = vld [vmem:[#allocation5 + $0x52c] sm:$0xf0]  ;;  %v5196_v36 = vld [vmem:[#allocation5 + $0x2c4] sm:$0xf]  ;;  %v3675_v45 = vor.u32 %v5164_v33, %v3672_v35 }
  0x56   :  { %v4102_v51 = vld [vmem:[#allocation5 + $0x520] sm:$0xf]  ;;  %v5306_v55 = vld [vmem:[#allocation5 + $0x62c] sm:$0xf0]  ;;  %v3975_v59 = vor.u32 %v5242_v50, %v3974_v49  ;;  %1763 = vmatpush.bf16.msrb.mxu1 %v4119_v47  ;;  %1776 = vmatpush.bf16.msrb.mxu2 %v4247_v48  ;;  %v3800_v37 = vld [vmem:[#allocation5 + $0x2d0] sm:$0xf0] }
  0x57   :  { %v4230_v54 = vld [vmem:[#allocation5 + $0x620] sm:$0xf]  ;;  %v5338_v57 = vld [vmem:[#allocation5 + $0x72c] sm:$0xf0]  ;;  %v4103_v63 = vor.u32 %v5274_v53, %v4102_v51  ;;  %1789 = vmatpush.bf16.msrb.mxu3 %v4375_v52  ;;  %v5228_v39 = vld [vmem:[#allocation5 + $0x3c4] sm:$0xf]  ;;  %v3803_v46 = vor.u32 %v5196_v36, %v3800_v37 }
  0x58   :  { %v4358_v56 = vld [vmem:[#allocation5 + $0x720] sm:$0xf]  ;;  %v5238_v60 = vld [vmem:[#allocation5 + $0x40c] sm:$0xf0]  ;;  %v4231_v0 = vor.u32 %v5306_v55, %v4230_v54  ;;  %1751 = vmatpush.bf16.msrb.mxu0 %v3975_v59  ;;  %v3928_v40 = vld [vmem:[#allocation5 + $0x3d0] sm:$0xf0] }
  0x59   :  { %v3958_v58 = vld [vmem:[#allocation5 + $0x400] sm:$0xf]  ;;  %v5270_v62 = vld [vmem:[#allocation5 + $0x50c] sm:$0xf0]  ;;  %v4359_v4 = vor.u32 %v5338_v57, %v4358_v56  ;;  %v5128_v47 = vld [vmem:[#allocation5 + $0xa4] sm:$0xf]  ;;  %v3931_v50 = vor.u32 %v5228_v39, %v3928_v40 }
  0x5a   :  { %v4086_v61 = vld [vmem:[#allocation5 + $0x500] sm:$0xf]  ;;  %v5302_v2 = vld [vmem:[#allocation5 + $0x60c] sm:$0xf0]  ;;  %v3959_v11 = vor.u32 %v5238_v60, %v3958_v58  ;;  %1764 = vmatpush.bf16.msrb.mxu1 %v4103_v63  ;;  %1777 = vmatpush.bf16.msrb.mxu2 %v4231_v0  ;;  %v3528_v48 = vld [vmem:[#allocation5 + $0xb0] sm:$0xf0] }
  0x5b   :  { %v4214_v1 = vld [vmem:[#allocation5 + $0x600] sm:$0xf]  ;;  %v5334_v6 = vld [vmem:[#allocation5 + $0x70c] sm:$0xf0]  ;;  %v4087_v16 = vor.u32 %v5270_v62, %v4086_v61  ;;  %1790 = vmatpush.bf16.msrb.mxu3 %v4359_v4  ;;  %v5160_v49 = vld [vmem:[#allocation5 + $0x1a4] sm:$0xf]  ;;  %v3531_v56 = vor.u32 %v5128_v47, %v3528_v48 }
  0x5c   :  { %v4342_v5 = vld [vmem:[#allocation5 + $0x700] sm:$0xf]  ;;  %v117_v7 = vld [vmem:[#allocation2 + $0x10] sm:$0xff]  ;;  %v4215_v17 = vor.u32 %v5302_v2, %v4214_v1  ;;  %1752 = vmatpush.bf16.msrb.mxu0 %v3959_v11  ;;  %v5192_v52 = vld [vmem:[#allocation5 + $0x2a4] sm:$0xf] }
  0x5d   :  { %v393_v24 = vunpack.c.l.b16 %v117_v7  ;;  %v4343_v26 = vor.u32 %v5334_v6, %v4342_v5  ;;  %v394_v28 = vunpack.c.h.b16 %v117_v7  ;;  %v3656_v51 = vld [vmem:[#allocation5 + $0x1b0] sm:$0xf0]  ;;  %v5224_v54 = vld [vmem:[#allocation5 + $0x3a4] sm:$0xf] }
  0x5e   :  { %1765 = vmatpush.bf16.msrb.mxu1 %v4087_v16  ;;  %1778 = vmatpush.bf16.msrb.mxu2 %v4215_v17  ;;  %v3784_v53 = vld [vmem:[#allocation5 + $0x2b0] sm:$0xf0]  ;;  %v3659_v57 = vor.u32 %v5160_v49, %v3656_v51  ;;  %v5124_v59 = vld [vmem:[#allocation5 + $0x84] sm:$0xf] }
  0x5f   :  { %v5798_v41 = vpack.c.b16 %v393_v24, %v393_v24  ;;  %1791 = vmatpush.bf16.msrb.mxu3 %v4343_v26  ;;  %v5802_v44 = vpack.c.b16 %v394_v28, %v394_v28  ;;  %v3912_v55 = vld [vmem:[#allocation5 + $0x3b0] sm:$0xf0]  ;;  %v3787_v58 = vor.u32 %v5192_v52, %v3784_v53  ;;  %v5156_v61 = vld [vmem:[#allocation5 + $0x184] sm:$0xf] }
  0x60   :  { %1797 = vmatpush.bf16.msra.mxu0 %v3563_v27  ;;  %v3512_v60 = vld [vmem:[#allocation5 + $0x90] sm:$0xf0]  ;;  %v3915_v62 = vor.u32 %v5224_v54, %v3912_v55  ;;  %v5188_v0 = vld [vmem:[#allocation5 + $0x284] sm:$0xf] }
  0x61   :  { %1779 = vmatmul.bf16.vlgmr.msrb.gmra.mxu2 %v5796_v38  ;;  %1753 = vmatmul.bf16.vlgmr.msrb.gmra.mxu0 %v5798_v41  ;;  %v3640_v63 = vld [vmem:[#allocation5 + $0x190] sm:$0xf0]  ;;  %v5220_v2 = vld [vmem:[#allocation5 + $0x384] sm:$0xf]  ;;  %v3515_v4 = vor.u32 %v5124_v59, %v3512_v60 }
  0x62   :  { %1810 = vmatpush.bf16.msra.mxu1 %v3691_v29  ;;  %1823 = vmatpush.bf16.msra.mxu2 %v3819_v30  ;;  %v3768_v1 = vld [vmem:[#allocation5 + $0x290] sm:$0xf0]  ;;  %v3643_v5 = vor.u32 %v5156_v61, %v3640_v63  ;;  %v5120_v7 = vld [vmem:[#allocation5 + $0x64] sm:$0xf] }
  0x63   :  { %1836 = vmatpush.bf16.msra.mxu3 %v3947_v34  ;;  %1766 = vmatmul.bf16.vlgmr.msrb.gmra.mxu1 %v5802_v44  ;;  %v3896_v3 = vld [vmem:[#allocation5 + $0x390] sm:$0xf0]  ;;  %v3771_v6 = vor.u32 %v5188_v0, %v3768_v1  ;;  %v5152_v9 = vld [vmem:[#allocation5 + $0x164] sm:$0xf] }
  0x64   :  { %1792 = vmatmul.bf16.vlgmr.msrb.gmra.mxu3 %v5800_v42  ;;  %1798 = vmatpush.bf16.msra.mxu0 %v3547_v43  ;;  %v3496_v8 = vld [vmem:[#allocation5 + $0x70] sm:$0xf0]  ;;  %v3899_v10 = vor.u32 %v5220_v2, %v3896_v3  ;;  %v5184_v12 = vld [vmem:[#allocation5 + $0x264] sm:$0xf] }
  0x65   :  { %v3624_v11 = vld [vmem:[#allocation5 + $0x170] sm:$0xf0]  ;;  %v5216_v14 = vld [vmem:[#allocation5 + $0x364] sm:$0xf]  ;;  %v3499_v16 = vor.u32 %v5120_v7, %v3496_v8 }
  0x66   :  { %1811 = vmatpush.bf16.msra.mxu1 %v3675_v45  ;;  %1824 = vmatpush.bf16.msra.mxu2 %v3803_v46  ;;  %v3752_v13 = vld [vmem:[#allocation5 + $0x270] sm:$0xf0]  ;;  %v3627_v17 = vor.u32 %v5152_v9, %v3624_v11  ;;  %v5116_v23 = vld [vmem:[#allocation5 + $0x44] sm:$0xf] }
  0x67   :  { %1837 = vmatpush.bf16.msra.mxu3 %v3931_v50  ;;  %v3880_v15 = vld [vmem:[#allocation5 + $0x370] sm:$0xf0]  ;;  %v3755_v21 = vor.u32 %v5184_v12, %v3752_v13  ;;  %v5148_v25 = vld [vmem:[#allocation5 + $0x144] sm:$0xf] }
  0x68   :  { %1799 = vmatpush.bf16.msra.mxu0 %v3531_v56  ;;  %v3480_v24 = vld [vmem:[#allocation5 + $0x50] sm:$0xf0]  ;;  %v3883_v26 = vor.u32 %v5216_v14, %v3880_v15  ;;  %v5180_v28 = vld [vmem:[#allocation5 + $0x244] sm:$0xf] }
  0x69   :  { %v3608_v27 = vld [vmem:[#allocation5 + $0x150] sm:$0xf0]  ;;  %v5212_v30 = vld [vmem:[#allocation5 + $0x344] sm:$0xf]  ;;  %v3483_v32 = vor.u32 %v5116_v23, %v3480_v24 }
  0x6a   :  { %1812 = vmatpush.bf16.msra.mxu1 %v3659_v57  ;;  %1825 = vmatpush.bf16.msra.mxu2 %v3787_v58  ;;  %v3736_v29 = vld [vmem:[#allocation5 + $0x250] sm:$0xf0]  ;;  %v3611_v33 = vor.u32 %v5148_v25, %v3608_v27  ;;  %v5112_v35 = vld [vmem:[#allocation5 + $0x24] sm:$0xf] }
  0x6b   :  { %1838 = vmatpush.bf16.msra.mxu3 %v3915_v62  ;;  %v3864_v31 = vld [vmem:[#allocation5 + $0x350] sm:$0xf0]  ;;  %v3739_v34 = vor.u32 %v5180_v28, %v3736_v29  ;;  %v5144_v37 = vld [vmem:[#allocation5 + $0x124] sm:$0xf] }
  0x6c   :  { %1800 = vmatpush.bf16.msra.mxu0 %v3515_v4  ;;  %v3464_v36 = vld [vmem:[#allocation5 + $0x30] sm:$0xf0]  ;;  %v3867_v39 = vor.u32 %v5212_v30, %v3864_v31  ;;  %v5176_v43 = vld [vmem:[#allocation5 + $0x224] sm:$0xf] }
  0x6d   :  { %v3592_v40 = vld [vmem:[#allocation5 + $0x130] sm:$0xf0]  ;;  %v5208_v46 = vld [vmem:[#allocation5 + $0x324] sm:$0xf]  ;;  %v3467_v48 = vor.u32 %v5112_v35, %v3464_v36 }
  0x6e   :  { %1813 = vmatpush.bf16.msra.mxu1 %v3643_v5  ;;  %1826 = vmatpush.bf16.msra.mxu2 %v3771_v6  ;;  %v3720_v45 = vld [vmem:[#allocation5 + $0x230] sm:$0xf0]  ;;  %v5108_v49 = vld [vmem:[#allocation5 + $0x4] sm:$0xf]  ;;  %v3595_v51 = vor.u32 %v5144_v37, %v3592_v40 }
  0x6f   :  { %1839 = vmatpush.bf16.msra.mxu3 %v3899_v10  ;;  %v3848_v47 = vld [vmem:[#allocation5 + $0x330] sm:$0xf0]  ;;  %v3723_v52 = vor.u32 %v5176_v43, %v3720_v45  ;;  %v5140_v53 = vld [vmem:[#allocation5 + $0x104] sm:$0xf] }
  0x70   :  { %1801 = vmatpush.bf16.msra.mxu0 %v3499_v16  ;;  %v3448_v50 = vld [vmem:[#allocation5 + $0x10] sm:$0xf0]  ;;  %v5172_v55 = vld [vmem:[#allocation5 + $0x204] sm:$0xf]  ;;  %v3851_v56 = vor.u32 %v5208_v46, %v3848_v47 }
  0x71   :  { %v3576_v54 = vld [vmem:[#allocation5 + $0x110] sm:$0xf0]  ;;  %v5204_v58 = vld [vmem:[#allocation5 + $0x304] sm:$0xf]  ;;  %v3451_v63 = vor.u32 %v5108_v49, %v3448_v50 }
  0x72   :  { %1814 = vmatpush.bf16.msra.mxu1 %v3627_v17  ;;  %1827 = vmatpush.bf16.msra.mxu2 %v3755_v21  ;;  %v3704_v57 = vld [vmem:[#allocation5 + $0x210] sm:$0xf0]  ;;  %v5264_v60 = vld [vmem:[#allocation5 + $0x4e4] sm:$0xf]  ;;  %v3579_v3 = vor.u32 %v5140_v53, %v3576_v54 }
  0x73   :  { %1840 = vmatpush.bf16.msra.mxu3 %v3883_v26  ;;  %v3832_v59 = vld [vmem:[#allocation5 + $0x310] sm:$0xf0]  ;;  %v5296_v62 = vld [vmem:[#allocation5 + $0x5e4] sm:$0xf]  ;;  %v3707_v4 = vor.u32 %v5172_v55, %v3704_v57 }
  0x74   :  { %1802 = vmatpush.bf16.msra.mxu0 %v3483_v32  ;;  %v4072_v61 = vld [vmem:[#allocation5 + $0x4f0] sm:$0xf0]  ;;  %v5328_v1 = vld [vmem:[#allocation5 + $0x6e4] sm:$0xf]  ;;  %v3835_v7 = vor.u32 %v5204_v58, %v3832_v59 }
  0x75   :  { %v4200_v0 = vld [vmem:[#allocation5 + $0x5f0] sm:$0xf0]  ;;  %v5360_v5 = vld [vmem:[#allocation5 + $0x7e4] sm:$0xf]  ;;  %v4075_v8 = vor.u32 %v5264_v60, %v4072_v61 }
  0x76   :  { %1815 = vmatpush.bf16.msra.mxu1 %v3611_v33  ;;  %1828 = vmatpush.bf16.msra.mxu2 %v3739_v34  ;;  %v4328_v2 = vld [vmem:[#allocation5 + $0x6f0] sm:$0xf0]  ;;  %v4203_v9 = vor.u32 %v5296_v62, %v4200_v0  ;;  %v5260_v11 = vld [vmem:[#allocation5 + $0x4c4] sm:$0xf] }
  0x77   :  { %1841 = vmatpush.bf16.msra.mxu3 %v3867_v39  ;;  %v4456_v6 = vld [vmem:[#allocation5 + $0x7f0] sm:$0xf0]  ;;  %v4331_v10 = vor.u32 %v5328_v1, %v4328_v2  ;;  %v5292_v13 = vld [vmem:[#allocation5 + $0x5c4] sm:$0xf] }
  0x78   :  { %1803 = vmatpush.bf16.msra.mxu0 %v3467_v48  ;;  %v4056_v12 = vld [vmem:[#allocation5 + $0x4d0] sm:$0xf0]  ;;  %v4459_v14 = vor.u32 %v5360_v5, %v4456_v6  ;;  %v5324_v16 = vld [vmem:[#allocation5 + $0x6c4] sm:$0xf] }
  0x79   :  { %v4184_v15 = vld [vmem:[#allocation5 + $0x5d0] sm:$0xf0]  ;;  %v5356_v21 = vld [vmem:[#allocation5 + $0x7c4] sm:$0xf]  ;;  %v4059_v24 = vor.u32 %v5260_v11, %v4056_v12 }
  0x7a   :  { %1816 = vmatpush.bf16.msra.mxu1 %v3595_v51  ;;  %1829 = vmatpush.bf16.msra.mxu2 %v3723_v52  ;;  %v4312_v17 = vld [vmem:[#allocation5 + $0x6d0] sm:$0xf0]  ;;  %v4187_v25 = vor.u32 %v5292_v13, %v4184_v15  ;;  %v5256_v27 = vld [vmem:[#allocation5 + $0x4a4] sm:$0xf] }
  0x7b   :  { %1842 = vmatpush.bf16.msra.mxu3 %v3851_v56  ;;  %v4440_v23 = vld [vmem:[#allocation5 + $0x7d0] sm:$0xf0]  ;;  %v4315_v26 = vor.u32 %v5324_v16, %v4312_v17  ;;  %v5288_v29 = vld [vmem:[#allocation5 + $0x5a4] sm:$0xf] }
  0x7c   :  { %1804 = vmatpush.bf16.msra.mxu0 %v3451_v63  ;;  %v4040_v28 = vld [vmem:[#allocation5 + $0x4b0] sm:$0xf0]  ;;  %v4443_v30 = vor.u32 %v5356_v21, %v4440_v23  ;;  %v5320_v32 = vld [vmem:[#allocation5 + $0x6a4] sm:$0xf] }
  0x7d   :  { %v4168_v31 = vld [vmem:[#allocation5 + $0x5b0] sm:$0xf0]  ;;  %v5352_v34 = vld [vmem:[#allocation5 + $0x7a4] sm:$0xf]  ;;  %v4043_v36 = vor.u32 %v5256_v27, %v4040_v28 }
  0x7e   :  { %1817 = vmatpush.bf16.msra.mxu1 %v3579_v3  ;;  %1830 = vmatpush.bf16.msra.mxu2 %v3707_v4  ;;  %v4296_v33 = vld [vmem:[#allocation5 + $0x6b0] sm:$0xf0]  ;;  %v4171_v37 = vor.u32 %v5288_v29, %v4168_v31  ;;  %v5252_v40 = vld [vmem:[#allocation5 + $0x484] sm:$0xf] }
  0x7f   :  { %1843 = vmatpush.bf16.msra.mxu3 %v3835_v7  ;;  %v4424_v35 = vld [vmem:[#allocation5 + $0x7b0] sm:$0xf0]  ;;  %1805 = vmatmul.bf16.vlgmr.msra.gmra.mxu0 %v5786_v19  ;;  %v4299_v39 = vor.u32 %v5320_v32, %v4296_v33  ;;  %v5284_v45 = vld [vmem:[#allocation5 + $0x584] sm:$0xf] }
  0x80   :  { %1849 = vmatpush.bf16.msrb.mxu0 %v4075_v8  ;;  %v4024_v43 = vld [vmem:[#allocation5 + $0x490] sm:$0xf0]  ;;  %v4427_v46 = vor.u32 %v5352_v34, %v4424_v35  ;;  %v5316_v48 = vld [vmem:[#allocation5 + $0x684] sm:$0xf] }
  0x81   :  { %1831 = vmatmul.bf16.vlgmr.msra.gmra.mxu2 %v5784_v18  ;;  %1818 = vmatmul.bf16.vlgmr.msra.gmra.mxu1 %v5790_v22  ;;  %v4152_v47 = vld [vmem:[#allocation5 + $0x590] sm:$0xf0]  ;;  %v5348_v50 = vld [vmem:[#allocation5 + $0x784] sm:$0xf]  ;;  %v4027_v52 = vor.u32 %v5252_v40, %v4024_v43  ;;  %v3566_v43 = vld [vmem:[#allocation5 + $0xe8] sm:$0xf] }
  0x82   :  { %1862 = vmatpush.bf16.msrb.mxu1 %v4203_v9  ;;  %1875 = vmatpush.bf16.msrb.mxu2 %v4331_v10  ;;  %v4280_v49 = vld [vmem:[#allocation5 + $0x690] sm:$0xf0]  ;;  %v4155_v53 = vor.u32 %v5284_v45, %v4152_v47  ;;  %v5248_v55 = vld [vmem:[#allocation5 + $0x464] sm:$0xf]  ;;  %v5139_v45 = vld [vmem:[#allocation5 + $0xf4] sm:$0xf0] }
  0x83   :  { %1888 = vmatpush.bf16.msrb.mxu3 %v4459_v14  ;;  %v4408_v51 = vld [vmem:[#allocation5 + $0x790] sm:$0xf0]  ;;  %v4283_v54 = vor.u32 %v5316_v48, %v4280_v49  ;;  %v5280_v57 = vld [vmem:[#allocation5 + $0x564] sm:$0xf]  ;;  %v5171_v48 = vld [vmem:[#allocation5 + $0x1f4] sm:$0xf0] }
  0x84   :  { %1844 = vmatmul.bf16.vlgmr.msra.gmra.mxu3 %v5788_v20  ;;  %1850 = vmatpush.bf16.msrb.mxu0 %v4059_v24  ;;  %v4008_v56 = vld [vmem:[#allocation5 + $0x470] sm:$0xf0]  ;;  %v4411_v58 = vor.u32 %v5348_v50, %v4408_v51  ;;  %v5312_v60 = vld [vmem:[#allocation5 + $0x664] sm:$0xf]  ;;  %v3822_v49 = vld [vmem:[#allocation5 + $0x2e8] sm:$0xf] }
  0x85   :  { %v4136_v59 = vld [vmem:[#allocation5 + $0x570] sm:$0xf0]  ;;  %v5344_v62 = vld [vmem:[#allocation5 + $0x764] sm:$0xf]  ;;  %v4011_v0 = vor.u32 %v5248_v55, %v4008_v56  ;;  %v5203_v50 = vld [vmem:[#allocation5 + $0x2f4] sm:$0xf0]  ;;  %v3567_v56 = vor.u32 %v5139_v45, %v3566_v43 }
  0x86   :  { %1863 = vmatpush.bf16.msrb.mxu1 %v4187_v25  ;;  %1876 = vmatpush.bf16.msrb.mxu2 %v4315_v26  ;;  %v4264_v61 = vld [vmem:[#allocation5 + $0x670] sm:$0xf0]  ;;  %v4139_v1 = vor.u32 %v5280_v57, %v4136_v59  ;;  %v5244_v3 = vld [vmem:[#allocation5 + $0x444] sm:$0xf]  ;;  %v3550_v59 = vld [vmem:[#allocation5 + $0xc8] sm:$0xf] }
  0x87   :  { %1889 = vmatpush.bf16.msrb.mxu3 %v4443_v30  ;;  %v4392_v63 = vld [vmem:[#allocation5 + $0x770] sm:$0xf0]  ;;  %v4267_v2 = vor.u32 %v5312_v60, %v4264_v61  ;;  %v5276_v5 = vld [vmem:[#allocation5 + $0x544] sm:$0xf]  ;;  %v5135_v60 = vld [vmem:[#allocation5 + $0xd4] sm:$0xf0] }
  0x88   :  { %1851 = vmatpush.bf16.msrb.mxu0 %v4043_v36  ;;  %v3992_v4 = vld [vmem:[#allocation5 + $0x450] sm:$0xf0]  ;;  %v4395_v6 = vor.u32 %v5344_v62, %v4392_v63  ;;  %v5308_v8 = vld [vmem:[#allocation5 + $0x644] sm:$0xf]  ;;  %v3678_v61 = vld [vmem:[#allocation5 + $0x1c8] sm:$0xf] }
  0x89   :  { %v4120_v7 = vld [vmem:[#allocation5 + $0x550] sm:$0xf0]  ;;  %v5340_v10 = vld [vmem:[#allocation5 + $0x744] sm:$0xf]  ;;  %v3995_v12 = vor.u32 %v5244_v3, %v3992_v4  ;;  %v5167_v63 = vld [vmem:[#allocation5 + $0x1d4] sm:$0xf0]  ;;  %v3551_v4 = vor.u32 %v5135_v60, %v3550_v59 }
  0x8a   :  { %1864 = vmatpush.bf16.msrb.mxu1 %v4171_v37  ;;  %1877 = vmatpush.bf16.msrb.mxu2 %v4299_v39  ;;  %v4248_v9 = vld [vmem:[#allocation5 + $0x650] sm:$0xf0]  ;;  %v4123_v13 = vor.u32 %v5276_v5, %v4120_v7  ;;  %v5240_v15 = vld [vmem:[#allocation5 + $0x424] sm:$0xf]  ;;  %v5231_v3 = vld [vmem:[#allocation5 + $0x3d4] sm:$0xf0]  ;;  %v3679_v5 = vor.u32 %v5167_v63, %v3678_v61 }
  0x8b   :  { %1890 = vmatpush.bf16.msrb.mxu3 %v4427_v46  ;;  %v4376_v11 = vld [vmem:[#allocation5 + $0x750] sm:$0xf0]  ;;  %v4251_v14 = vor.u32 %v5308_v8, %v4248_v9  ;;  %v5272_v17 = vld [vmem:[#allocation5 + $0x524] sm:$0xf]  ;;  %v3694_v46 = vld [vmem:[#allocation5 + $0x1e8] sm:$0xf] }
  0x8c   :  { %1852 = vmatpush.bf16.msrb.mxu0 %v4027_v52  ;;  %v3976_v16 = vld [vmem:[#allocation5 + $0x430] sm:$0xf0]  ;;  %v4379_v21 = vor.u32 %v5340_v10, %v4376_v11  ;;  %v5304_v24 = vld [vmem:[#allocation5 + $0x624] sm:$0xf]  ;;  %v3695_v57 = vor.u32 %v5171_v48, %v3694_v46  ;;  %v3534_v7 = vld [vmem:[#allocation5 + $0xa8] sm:$0xf] }
  0x8d   :  { %v4104_v23 = vld [vmem:[#allocation5 + $0x530] sm:$0xf0]  ;;  %v5336_v26 = vld [vmem:[#allocation5 + $0x724] sm:$0xf]  ;;  %v3979_v28 = vor.u32 %v5240_v15, %v3976_v16  ;;  %v5131_v8 = vld [vmem:[#allocation5 + $0xb4] sm:$0xf0] }
  0x8e   :  { %1865 = vmatpush.bf16.msrb.mxu1 %v4155_v53  ;;  %1878 = vmatpush.bf16.msrb.mxu2 %v4283_v54  ;;  %v4232_v25 = vld [vmem:[#allocation5 + $0x630] sm:$0xf0]  ;;  %v5236_v29 = vld [vmem:[#allocation5 + $0x404] sm:$0xf]  ;;  %v4107_v31 = vor.u32 %v5272_v17, %v4104_v23  ;;  %v3950_v53 = vld [vmem:[#allocation5 + $0x3e8] sm:$0xf]  ;;  %v3535_v16 = vor.u32 %v5131_v8, %v3534_v7 }
  0x8f   :  { %1891 = vmatpush.bf16.msrb.mxu3 %v4411_v58  ;;  %v4360_v27 = vld [vmem:[#allocation5 + $0x730] sm:$0xf0]  ;;  %v4235_v32 = vor.u32 %v5304_v24, %v4232_v25  ;;  %v5268_v33 = vld [vmem:[#allocation5 + $0x504] sm:$0xf]  ;;  %v5235_v54 = vld [vmem:[#allocation5 + $0x3f4] sm:$0xf0]  ;;  %v3823_v58 = vor.u32 %v5203_v50, %v3822_v49 }
  0x90   :  { %1853 = vmatpush.bf16.msrb.mxu0 %v4011_v0  ;;  %v3960_v30 = vld [vmem:[#allocation5 + $0x410] sm:$0xf0]  ;;  %v5300_v35 = vld [vmem:[#allocation5 + $0x604] sm:$0xf]  ;;  %v4363_v36 = vor.u32 %v5336_v26, %v4360_v27  ;;  %v3951_v62 = vor.u32 %v5235_v54, %v3950_v53  ;;  %v3806_v0 = vld [vmem:[#allocation5 + $0x2c8] sm:$0xf] }
  0x91   :  { %v4088_v34 = vld [vmem:[#allocation5 + $0x510] sm:$0xf0]  ;;  %v5332_v39 = vld [vmem:[#allocation5 + $0x704] sm:$0xf]  ;;  %v3963_v47 = vor.u32 %v5236_v29, %v3960_v30  ;;  %v3662_v9 = vld [vmem:[#allocation5 + $0x1a8] sm:$0xf] }
  0x92   :  { %1866 = vmatpush.bf16.msrb.mxu1 %v4139_v1  ;;  %1879 = vmatpush.bf16.msrb.mxu2 %v4267_v2  ;;  %v4216_v37 = vld [vmem:[#allocation5 + $0x610] sm:$0xf0]  ;;  %v4091_v51 = vor.u32 %v5268_v33, %v4088_v34  ;;  %v5199_v1 = vld [vmem:[#allocation5 + $0x2d4] sm:$0xf0]  ;;  %v3934_v2 = vld [vmem:[#allocation5 + $0x3c8] sm:$0xf] }
  0x93   :  { %1892 = vmatpush.bf16.msrb.mxu3 %v4395_v6  ;;  %v4344_v40 = vld [vmem:[#allocation5 + $0x710] sm:$0xf0]  ;;  %v4219_v52 = vor.u32 %v5300_v35, %v4216_v37  ;;  %v3807_v6 = vor.u32 %v5199_v1, %v3806_v0  ;;  %v3935_v10 = vor.u32 %v5231_v3, %v3934_v2  ;;  %v5163_v11 = vld [vmem:[#allocation5 + $0x1b4] sm:$0xf0]  ;;  %v3518_v23 = vld [vmem:[#allocation5 + $0x88] sm:$0xf] }
  0x94   :  { %1854 = vmatpush.bf16.msrb.mxu0 %v3995_v12  ;;  %v4347_v55 = vor.u32 %v5332_v39, %v4344_v40  ;;  %v3790_v12 = vld [vmem:[#allocation5 + $0x2a8] sm:$0xf]  ;;  %v5227_v15 = vld [vmem:[#allocation5 + $0x3b4] sm:$0xf0]  ;;  %v3663_v17 = vor.u32 %v5163_v11, %v3662_v9 }
  0x95   :  { %v5127_v24 = vld [vmem:[#allocation5 + $0x94] sm:$0xf0]  ;;  %v3646_v25 = vld [vmem:[#allocation5 + $0x188] sm:$0xf] }
  0x96   :  { %1867 = vmatpush.bf16.msrb.mxu1 %v4123_v13  ;;  %1880 = vmatpush.bf16.msrb.mxu2 %v4251_v14  ;;  %v5195_v13 = vld [vmem:[#allocation5 + $0x2b4] sm:$0xf0]  ;;  %v3918_v14 = vld [vmem:[#allocation5 + $0x3a8] sm:$0xf] }
  0x97   :  { %1893 = vmatpush.bf16.msrb.mxu3 %v4379_v21  ;;  %v3791_v21 = vor.u32 %v5195_v13, %v3790_v12  ;;  %v3919_v26 = vor.u32 %v5227_v15, %v3918_v14  ;;  %v5159_v27 = vld [vmem:[#allocation5 + $0x194] sm:$0xf0]  ;;  %v3902_v30 = vld [vmem:[#allocation5 + $0x388] sm:$0xf] }
  0x98   :  { %1855 = vmatpush.bf16.msrb.mxu0 %v3979_v28  ;;  %v3774_v28 = vld [vmem:[#allocation5 + $0x288] sm:$0xf]  ;;  %v5191_v29 = vld [vmem:[#allocation5 + $0x294] sm:$0xf0]  ;;  %v3647_v33 = vor.u32 %v5159_v27, %v3646_v25 }
  0x99   :  { %v3775_v34 = vor.u32 %v5191_v29, %v3774_v28  ;;  %v3502_v35 = vld [vmem:[#allocation5 + $0x68] sm:$0xf]  ;;  %v5155_v40 = vld [vmem:[#allocation5 + $0x174] sm:$0xf0] }
  0x9a   :  { %1868 = vmatpush.bf16.msrb.mxu1 %v4107_v31  ;;  %1881 = vmatpush.bf16.msrb.mxu2 %v4235_v32  ;;  %v5223_v31 = vld [vmem:[#allocation5 + $0x394] sm:$0xf0]  ;;  %v3519_v32 = vor.u32 %v5127_v24, %v3518_v23  ;;  %v3630_v37 = vld [vmem:[#allocation5 + $0x168] sm:$0xf] }
  0x9b   :  { %1894 = vmatpush.bf16.msrb.mxu3 %v4363_v36  ;;  %v5123_v36 = vld [vmem:[#allocation5 + $0x74] sm:$0xf0]  ;;  %v3903_v39 = vor.u32 %v5223_v31, %v3902_v30  ;;  %v3758_v43 = vld [vmem:[#allocation5 + $0x268] sm:$0xf]  ;;  %v3631_v49 = vor.u32 %v5155_v40, %v3630_v37 }
  0x9c   :  { %1856 = vmatpush.bf16.msrb.mxu0 %v3963_v47  ;;  %v5187_v45 = vld [vmem:[#allocation5 + $0x274] sm:$0xf0]  ;;  %v3886_v46 = vld [vmem:[#allocation5 + $0x368] sm:$0xf]  ;;  %v3503_v48 = vor.u32 %v5123_v36, %v3502_v35 }
  0x9d   :  { %v5219_v47 = vld [vmem:[#allocation5 + $0x374] sm:$0xf0]  ;;  %v3759_v50 = vor.u32 %v5187_v45, %v3758_v43  ;;  %v3614_v53 = vld [vmem:[#allocation5 + $0x148] sm:$0xf] }
  0x9e   :  { %1869 = vmatpush.bf16.msrb.mxu1 %v4091_v51  ;;  %1882 = vmatpush.bf16.msrb.mxu2 %v4219_v52  ;;  %v3486_v51 = vld [vmem:[#allocation5 + $0x48] sm:$0xf]  ;;  %v5119_v52 = vld [vmem:[#allocation5 + $0x54] sm:$0xf0]  ;;  %v3887_v54 = vor.u32 %v5219_v47, %v3886_v46 }
  0x9f   :  { %1895 = vmatpush.bf16.msrb.mxu3 %v4347_v55  ;;  %1857 = vmatmul.bf16.vlgmr.msrb.gmra.mxu0 %v5798_v41  ;;  %v5151_v55 = vld [vmem:[#allocation5 + $0x154] sm:$0xf0]  ;;  %v3487_v60 = vor.u32 %v5119_v52, %v3486_v51  ;;  %v3470_v63 = vld [vmem:[#allocation5 + $0x28] sm:$0xf] }
  0xa0   :  { %1901 = vmatpush.bf16.msra.mxu0 %v3567_v56  ;;  %v3742_v56 = vld [vmem:[#allocation5 + $0x248] sm:$0xf]  ;;  %v5215_v59 = vld [vmem:[#allocation5 + $0x354] sm:$0xf0]  ;;  %v3615_v61 = vor.u32 %v5151_v55, %v3614_v53 }
  0xa1   :  { %1883 = vmatmul.bf16.vlgmr.msrb.gmra.mxu2 %v5796_v38  ;;  %1870 = vmatmul.bf16.vlgmr.msrb.gmra.mxu1 %v5802_v44  ;;  %v5115_v0 = vld [vmem:[#allocation5 + $0x34] sm:$0xf0]  ;;  %v3598_v1 = vld [vmem:[#allocation5 + $0x128] sm:$0xf] }
  0xa2   :  { %1914 = vmatpush.bf16.msra.mxu1 %v3695_v57  ;;  %1927 = vmatpush.bf16.msra.mxu2 %v3823_v58  ;;  %v5183_v57 = vld [vmem:[#allocation5 + $0x254] sm:$0xf0]  ;;  %v3870_v58 = vld [vmem:[#allocation5 + $0x348] sm:$0xf]  ;;  %v3471_v8 = vor.u32 %v5115_v0, %v3470_v63 }
  0xa3   :  { %1940 = vmatpush.bf16.msra.mxu3 %v3951_v62  ;;  %v3743_v62 = vor.u32 %v5183_v57, %v3742_v56  ;;  %v3871_v2 = vor.u32 %v5215_v59, %v3870_v58  ;;  %v5147_v3 = vld [vmem:[#allocation5 + $0x134] sm:$0xf0]  ;;  %v3454_v9 = vld [vmem:[#allocation5 + $0x8] sm:$0xf] }
  0xa4   :  { %1896 = vmatmul.bf16.vlgmr.msrb.gmra.mxu3 %v5800_v42  ;;  %1902 = vmatpush.bf16.msra.mxu0 %v3551_v4  ;;  %v3726_v4 = vld [vmem:[#allocation5 + $0x228] sm:$0xf]  ;;  %v5211_v7 = vld [vmem:[#allocation5 + $0x334] sm:$0xf0]  ;;  %v3599_v11 = vor.u32 %v5147_v3, %v3598_v1 }
  0xa5   :  { %v3582_v13 = vld [vmem:[#allocation5 + $0x108] sm:$0xf]  ;;  %v5143_v14 = vld [vmem:[#allocation5 + $0x114] sm:$0xf0] }
  0xa6   :  { %1915 = vmatpush.bf16.msra.mxu1 %v3679_v5  ;;  %1928 = vmatpush.bf16.msra.mxu2 %v3807_v6  ;;  %v5179_v5 = vld [vmem:[#allocation5 + $0x234] sm:$0xf0]  ;;  %v3854_v6 = vld [vmem:[#allocation5 + $0x328] sm:$0xf]  ;;  %v3583_v31 = vor.u32 %v5143_v14, %v3582_v13 }
  0xa7   :  { %1941 = vmatpush.bf16.msra.mxu3 %v3935_v10  ;;  %v5111_v10 = vld [vmem:[#allocation5 + $0x14] sm:$0xf0]  ;;  %v3727_v12 = vor.u32 %v5179_v5, %v3726_v4  ;;  %v3710_v15 = vld [vmem:[#allocation5 + $0x208] sm:$0xf] }
  0xa8   :  { %1903 = vmatpush.bf16.msra.mxu0 %v3535_v16  ;;  %v3855_v16 = vor.u32 %v5211_v7, %v3854_v6  ;;  %v5207_v23 = vld [vmem:[#allocation5 + $0x314] sm:$0xf0]  ;;  %v4078_v24 = vld [vmem:[#allocation5 + $0x4e8] sm:$0xf]  ;;  %v3455_v27 = vor.u32 %v5111_v10, %v3454_v9 }
  0xa9   :  { %v5267_v25 = vld [vmem:[#allocation5 + $0x4f4] sm:$0xf0]  ;;  %v4334_v29 = vld [vmem:[#allocation5 + $0x6e8] sm:$0xf] }
  0xaa   :  { %1916 = vmatpush.bf16.msra.mxu1 %v3663_v17  ;;  %1929 = vmatpush.bf16.msra.mxu2 %v3791_v21  ;;  %v5175_v17 = vld [vmem:[#allocation5 + $0x214] sm:$0xf0]  ;;  %v3838_v21 = vld [vmem:[#allocation5 + $0x308] sm:$0xf]  ;;  %v4079_v36 = vor.u32 %v5267_v25, %v4078_v24 }
  0xab   :  { %1942 = vmatpush.bf16.msra.mxu3 %v3919_v26  ;;  %v4206_v26 = vld [vmem:[#allocation5 + $0x5e8] sm:$0xf]  ;;  %v5299_v28 = vld [vmem:[#allocation5 + $0x5f4] sm:$0xf0]  ;;  %v3839_v35 = vor.u32 %v5207_v23, %v3838_v21 }
  0xac   :  { %1904 = vmatpush.bf16.msra.mxu0 %v3519_v32  ;;  %v5331_v30 = vld [vmem:[#allocation5 + $0x6f4] sm:$0xf0]  ;;  %v3711_v32 = vor.u32 %v5175_v17, %v3710_v15  ;;  %v4207_v37 = vor.u32 %v5299_v28, %v4206_v26  ;;  %v4062_v40 = vld [vmem:[#allocation5 + $0x4c8] sm:$0xf]  ;;  %v5820_v26 = vld [vmem:[#allocation7] sm:$0xf] }
  0xad   :  { %v5263_v43 = vld [vmem:[#allocation5 + $0x4d4] sm:$0xf0]  ;;  %v4190_v45 = vld [vmem:[#allocation5 + $0x5c8] sm:$0xf] }
  0xae   :  { %1917 = vmatpush.bf16.msra.mxu1 %v3647_v33  ;;  %1930 = vmatpush.bf16.msra.mxu2 %v3775_v34  ;;  %v4462_v33 = vld [vmem:[#allocation5 + $0x7e8] sm:$0xf]  ;;  %v5363_v34 = vld [vmem:[#allocation5 + $0x7f4] sm:$0xf0]  ;;  %v4063_v52 = vor.u32 %v5263_v43, %v4062_v40 }
  0xaf   :  { %1943 = vmatpush.bf16.msra.mxu3 %v3903_v39  ;;  %v4335_v39 = vor.u32 %v5331_v30, %v4334_v29  ;;  %v4463_v46 = vor.u32 %v5363_v34, %v4462_v33  ;;  %v5295_v47 = vld [vmem:[#allocation5 + $0x5d4] sm:$0xf0]  ;;  %v4046_v55 = vld [vmem:[#allocation5 + $0x4a8] sm:$0xf] }
  0xb0   :  { %1905 = vmatpush.bf16.msra.mxu0 %v3503_v48  ;;  %v4318_v48 = vld [vmem:[#allocation5 + $0x6c8] sm:$0xf]  ;;  %v5359_v51 = vld [vmem:[#allocation5 + $0x7d4] sm:$0xf0]  ;;  %v4191_v53 = vor.u32 %v5295_v47, %v4190_v45 }
  0xb1   :  { %v5259_v56 = vld [vmem:[#allocation5 + $0x4b4] sm:$0xf0]  ;;  %v4174_v57 = vld [vmem:[#allocation5 + $0x5a8] sm:$0xf] }
  0xb2   :  { %1918 = vmatpush.bf16.msra.mxu1 %v3631_v49  ;;  %1931 = vmatpush.bf16.msra.mxu2 %v3759_v50  ;;  %v5327_v49 = vld [vmem:[#allocation5 + $0x6d4] sm:$0xf0]  ;;  %v4446_v50 = vld [vmem:[#allocation5 + $0x7c8] sm:$0xf]  ;;  %v4047_v0 = vor.u32 %v5259_v56, %v4046_v55 }
  0xb3   :  { %1944 = vmatpush.bf16.msra.mxu3 %v3887_v54  ;;  %v4319_v54 = vor.u32 %v5327_v49, %v4318_v48  ;;  %v4447_v58 = vor.u32 %v5359_v51, %v4446_v50  ;;  %v5291_v59 = vld [vmem:[#allocation5 + $0x5b4] sm:$0xf0]  ;;  %v4030_v3 = vld [vmem:[#allocation5 + $0x488] sm:$0xf] }
  0xb4   :  { %1906 = vmatpush.bf16.msra.mxu0 %v3487_v60  ;;  %v4302_v60 = vld [vmem:[#allocation5 + $0x6a8] sm:$0xf]  ;;  %v5355_v63 = vld [vmem:[#allocation5 + $0x7b4] sm:$0xf0]  ;;  %v4175_v1 = vor.u32 %v5291_v59, %v4174_v57 }
  0xb5   :  { %v5255_v4 = vld [vmem:[#allocation5 + $0x494] sm:$0xf0]  ;;  %v4158_v5 = vld [vmem:[#allocation5 + $0x588] sm:$0xf] }
  0xb6   :  { %1919 = vmatpush.bf16.msra.mxu1 %v3615_v61  ;;  %1932 = vmatpush.bf16.msra.mxu2 %v3743_v62  ;;  %v5323_v61 = vld [vmem:[#allocation5 + $0x6b4] sm:$0xf0]  ;;  %v4430_v62 = vld [vmem:[#allocation5 + $0x7a8] sm:$0xf] }
  0xb7   :  { %1945 = vmatpush.bf16.msra.mxu3 %v3871_v2  ;;  %v4303_v2 = vor.u32 %v5323_v61, %v4302_v60  ;;  %v4431_v6 = vor.u32 %v5355_v63, %v4430_v62  ;;  %v5287_v7 = vld [vmem:[#allocation5 + $0x594] sm:$0xf0]  ;;  %v4414_v10 = vld [vmem:[#allocation5 + $0x788] sm:$0xf] }
  0xb8   :  { %1907 = vmatpush.bf16.msra.mxu0 %v3471_v8  ;;  %v4286_v8 = vld [vmem:[#allocation5 + $0x688] sm:$0xf]  ;;  %v5319_v9 = vld [vmem:[#allocation5 + $0x694] sm:$0xf0]  ;;  %v4159_v14 = vor.u32 %v5287_v7, %v4158_v5 }
  0xb9   :  { %v4014_v13 = vld [vmem:[#allocation5 + $0x468] sm:$0xf]  ;;  %v4287_v15 = vor.u32 %v5319_v9, %v4286_v8  ;;  %v5283_v21 = vld [vmem:[#allocation5 + $0x574] sm:$0xf0] }
  0xba   :  { %1920 = vmatpush.bf16.msra.mxu1 %v3599_v11  ;;  %1933 = vmatpush.bf16.msra.mxu2 %v3727_v12  ;;  %v5351_v11 = vld [vmem:[#allocation5 + $0x794] sm:$0xf0]  ;;  %v4031_v12 = vor.u32 %v5255_v4, %v4030_v3  ;;  %v4142_v17 = vld [vmem:[#allocation5 + $0x568] sm:$0xf] }
  0xbb   :  { %1946 = vmatpush.bf16.msra.mxu3 %v3855_v16  ;;  %v5251_v16 = vld [vmem:[#allocation5 + $0x474] sm:$0xf0]  ;;  %v4415_v23 = vor.u32 %v5351_v11, %v4414_v10  ;;  %v4270_v24 = vld [vmem:[#allocation5 + $0x668] sm:$0xf] }
  0xbc   :  { %1908 = vmatpush.bf16.msra.mxu0 %v3455_v27  ;;  %v5315_v25 = vld [vmem:[#allocation5 + $0x674] sm:$0xf0]  ;;  %v4398_v27 = vld [vmem:[#allocation5 + $0x768] sm:$0xf]  ;;  %v4015_v29 = vor.u32 %v5251_v16, %v4014_v13  ;;  %v5137_v13 = vld [vmem:[#allocation5 + $0xec] sm:$0xf] }
  0xbd   :  { %v5347_v28 = vld [vmem:[#allocation5 + $0x774] sm:$0xf0]  ;;  %v3998_v30 = vld [vmem:[#allocation5 + $0x448] sm:$0xf] }
  0xbe   :  { %1921 = vmatpush.bf16.msra.mxu1 %v3583_v31  ;;  %1934 = vmatpush.bf16.msra.mxu2 %v3711_v32  ;;  %v4143_v31 = vor.u32 %v5283_v21, %v4142_v17  ;;  %v4271_v32 = vor.u32 %v5315_v25, %v4270_v24  ;;  %v5247_v33 = vld [vmem:[#allocation5 + $0x454] sm:$0xf0]  ;;  %v4126_v34 = vld [vmem:[#allocation5 + $0x548] sm:$0xf]  ;;  %v3696_v17 = vld [vmem:[#allocation5 + $0x1f8] sm:$0xf0] }
  0xbf   :  { %1947 = vmatpush.bf16.msra.mxu3 %v3839_v35  ;;  %1909 = vmatmul.bf16.vlgmr.msra.gmra.mxu0 %v5786_v19  ;;  %v377_v35 = vperm.slane %v5820_v26, 0  ;;  %v5311_v40 = vld [vmem:[#allocation5 + $0x654] sm:$0xf0]  ;;  %v4382_v43 = vld [vmem:[#allocation5 + $0x748] sm:$0xf] }
  0xc0   :  { %1953 = vmatpush.bf16.msrb.mxu0 %v4079_v36  ;;  %v4399_v36 = vor.u32 %v5347_v28, %v4398_v27  ;;  %v5343_v45 = vld [vmem:[#allocation5 + $0x754] sm:$0xf0]  ;;  %v3982_v50 = vld [vmem:[#allocation5 + $0x428] sm:$0xf]  ;;  %v5201_v21 = vld [vmem:[#allocation5 + $0x2ec] sm:$0xf] }
  0xc1   :  { %1935 = vmatmul.bf16.vlgmr.msra.gmra.mxu2 %v5784_v18  ;;  %1922 = vmatmul.bf16.vlgmr.msra.gmra.mxu1 %v5790_v22  ;;  %v5243_v51 = vld [vmem:[#allocation5 + $0x434] sm:$0xf0]  ;;  %v4383_v55 = vor.u32 %v5343_v45, %v4382_v43  ;;  %v4238_v57 = vld [vmem:[#allocation5 + $0x628] sm:$0xf]  ;;  %v3680_v43 = vld [vmem:[#allocation5 + $0x1d8] sm:$0xf0] }
  0xc2   :  { %1966 = vmatpush.bf16.msrb.mxu1 %v4207_v37  ;;  %1979 = vmatpush.bf16.msrb.mxu2 %v4335_v39  ;;  %v5279_v37 = vld [vmem:[#allocation5 + $0x554] sm:$0xf0]  ;;  %v4254_v39 = vld [vmem:[#allocation5 + $0x648] sm:$0xf]  ;;  %v3983_v62 = vor.u32 %v5243_v51, %v3982_v50  ;;  %v5197_v45 = vld [vmem:[#allocation5 + $0x2cc] sm:$0xf] }
  0xc3   :  { %1992 = vmatpush.bf16.msrb.mxu3 %v4463_v46  ;;  %v3999_v46 = vor.u32 %v5247_v33, %v3998_v30  ;;  %v4127_v48 = vor.u32 %v5279_v37, %v4126_v34  ;;  %v4255_v49 = vor.u32 %v5311_v40, %v4254_v39  ;;  %v5275_v56 = vld [vmem:[#allocation5 + $0x534] sm:$0xf0]  ;;  %v4366_v59 = vld [vmem:[#allocation5 + $0x728] sm:$0xf]  ;;  %v3952_v30 = vld [vmem:[#allocation5 + $0x3f8] sm:$0xf0] }
  0xc4   :  { %1948 = vmatmul.bf16.vlgmr.msra.gmra.mxu3 %v5788_v20  ;;  %1954 = vmatpush.bf16.msrb.mxu0 %v4063_v52  ;;  %v4110_v52 = vld [vmem:[#allocation5 + $0x528] sm:$0xf]  ;;  %v5339_v60 = vld [vmem:[#allocation5 + $0x734] sm:$0xf0]  ;;  %v3552_v37 = vld [vmem:[#allocation5 + $0xd8] sm:$0xf0] }
  0xc5   :  { %v3966_v63 = vld [vmem:[#allocation5 + $0x408] sm:$0xf]  ;;  %v5271_v4 = vld [vmem:[#allocation5 + $0x514] sm:$0xf0]  ;;  %v4367_v7 = vor.u32 %v5339_v60, %v4366_v59  ;;  %v5165_v39 = vld [vmem:[#allocation5 + $0x1cc] sm:$0xf] }
  0xc6   :  { %1967 = vmatpush.bf16.msrb.mxu1 %v4191_v53  ;;  %1980 = vmatpush.bf16.msrb.mxu2 %v4319_v54  ;;  %v4094_v3 = vld [vmem:[#allocation5 + $0x508] sm:$0xf]  ;;  %v5303_v8 = vld [vmem:[#allocation5 + $0x614] sm:$0xf0]  ;;  %v5193_v59 = vld [vmem:[#allocation5 + $0x2ac] sm:$0xf] }
  0xc7   :  { %1993 = vmatpush.bf16.msrb.mxu3 %v4447_v58  ;;  %v5307_v58 = vld [vmem:[#allocation5 + $0x634] sm:$0xf0]  ;;  %v4222_v5 = vld [vmem:[#allocation5 + $0x608] sm:$0xf]  ;;  %v4095_v27 = vor.u32 %v5271_v4, %v4094_v3  ;;  %v3792_v60 = vld [vmem:[#allocation5 + $0x2b8] sm:$0xf0] }
  0xc8   :  { %1955 = vmatpush.bf16.msrb.mxu0 %v4047_v0  ;;  %v5239_v0 = vld [vmem:[#allocation5 + $0x414] sm:$0xf0]  ;;  %v4350_v9 = vld [vmem:[#allocation5 + $0x708] sm:$0xf]  ;;  %v4223_v28 = vor.u32 %v5303_v8, %v4222_v5  ;;  %v3520_v3 = vld [vmem:[#allocation5 + $0x98] sm:$0xf0] }
  0xc9   :  { %v5335_v10 = vld [vmem:[#allocation5 + $0x714] sm:$0xf0]  ;;  %v3967_v16 = vor.u32 %v5239_v0, %v3966_v63  ;;  %v5157_v4 = vld [vmem:[#allocation5 + $0x18c] sm:$0xf]  ;;  %v3776_v8 = vld [vmem:[#allocation5 + $0x298] sm:$0xf0] }
  0xca   :  { %1968 = vmatpush.bf16.msrb.mxu1 %v4175_v1  ;;  %1981 = vmatpush.bf16.msrb.mxu2 %v4303_v2  ;;  %v1702_v47 = vpop.f32.mrf.mxu0  ;;  %v1715_v54 = vpop.f32.mrf.mxu1  ;;  %v4111_v1 = vor.u32 %v5275_v56, %v4110_v52  ;;  %v4239_v2 = vor.u32 %v5307_v58, %v4238_v57  ;;  %v3683_v52 = vor.u32 %v5165_v39, %v3680_v43  ;;  %v5161_v56 = vld [vmem:[#allocation5 + $0x1ac] sm:$0xf]  ;;  %v3664_v58 = vld [vmem:[#allocation5 + $0x1b8] sm:$0xf0] }
  0xcb   :  { %1994 = vmatpush.bf16.msrb.mxu3 %v4431_v6  ;;  %v1703_v53 = vadd.f32 %v1702_v47, %v377_v35  ;;  %v1728_v6 = vpop.f32.mrf.mxu2  ;;  %v5229_v47 = vld [vmem:[#allocation5 + $0x3cc] sm:$0xf]  ;;  %v3667_v0 = vor.u32 %v5161_v56, %v3664_v58  ;;  %v3616_v43 = vld [vmem:[#allocation5 + $0x158] sm:$0xf0] }
  0xcc   :  { %1956 = vmatpush.bf16.msrb.mxu0 %v4031_v12  ;;  %v1741_v12 = vpop.f32.mrf.mxu3  ;;  %v5149_v39 = vld [vmem:[#allocation5 + $0x14c] sm:$0xf] }
  0xcd   :  { %v1716_v61 = vadd.f32 %v1715_v54, %v1703_v53  ;;  %v5129_v54 = vld [vmem:[#allocation5 + $0xac] sm:$0xf] }
  0xce   :  { %1969 = vmatpush.bf16.msrb.mxu1 %v4159_v14  ;;  %1982 = vmatpush.bf16.msrb.mxu2 %v4287_v15  ;;  %v3568_v14 = vld [vmem:[#allocation5 + $0xf8] sm:$0xf0]  ;;  %v5169_v15 = vld [vmem:[#allocation5 + $0x1ec] sm:$0xf] }
  0xcf   :  { %1995 = vmatpush.bf16.msrb.mxu3 %v4415_v23  ;;  %v1729_v11 = vadd.f32 %v1728_v6, %v1716_v61  ;;  %v3824_v23 = vld [vmem:[#allocation5 + $0x2f8] sm:$0xf0]  ;;  %v3571_v33 = vor.u32 %v5137_v13, %v3568_v14  ;;  %v3699_v34 = vor.u32 %v5169_v15, %v3696_v17  ;;  %v5225_v61 = vld [vmem:[#allocation5 + $0x3ac] sm:$0xf] }
  0xd0   :  { %1957 = vmatpush.bf16.msrb.mxu0 %v4015_v29  ;;  %v5233_v29 = vld [vmem:[#allocation5 + $0x3ec] sm:$0xf]  ;;  %v3827_v35 = vor.u32 %v5201_v21, %v3824_v23  ;;  %v3648_v6 = vld [vmem:[#allocation5 + $0x198] sm:$0xf0] }
  0xd1   :  { %v5823_v24 = vadd.f32 %v1741_v12, %v1729_v11  ;;  %v3955_v40 = vor.u32 %v5233_v29, %v3952_v30  ;;  %v3651_v13 = vor.u32 %v5157_v4, %v3648_v6  ;;  %v5121_v15 = vld [vmem:[#allocation5 + $0x6c] sm:$0xf]  ;;  %v3760_v29 = vld [vmem:[#allocation5 + $0x278] sm:$0xf0] }
  0xd2   :  { %1970 = vmatpush.bf16.msrb.mxu1 %v4143_v31  ;;  %1983 = vmatpush.bf16.msrb.mxu2 %v4271_v32  ;;  %v1704_v25 = vpop.f32.mrf.mxu0  ;;  %v1717_v31 = vpop.f32.mrf.mxu1  ;;  %v4351_v32 = vor.u32 %v5335_v10, %v4350_v9  ;;  %v5221_v9 = vld [vmem:[#allocation5 + $0x38c] sm:$0xf]  ;;  %v3904_v10 = vld [vmem:[#allocation5 + $0x398] sm:$0xf0] }
  0xd3   :  { %1996 = vmatpush.bf16.msrb.mxu3 %v4399_v36  ;;  %v5133_v36 = vld [vmem:[#allocation5 + $0xcc] sm:$0xf]  ;;  %v3907_v25 = vor.u32 %v5221_v9, %v3904_v10  ;;  %v3888_v31 = vld [vmem:[#allocation5 + $0x378] sm:$0xf0] }
  0xd4   :  { %1958 = vmatpush.bf16.msrb.mxu0 %v3999_v46  ;;  %v3808_v46 = vld [vmem:[#allocation5 + $0x2d8] sm:$0xf0]  ;;  %v3555_v50 = vor.u32 %v5133_v36, %v3552_v37  ;;  %v1743_v51 = vpop.f32.mrf.mxu3  ;;  %v5153_v17 = vld [vmem:[#allocation5 + $0x16c] sm:$0xf] }
  0xd5   :  { %v3811_v53 = vor.u32 %v5197_v45, %v3808_v46  ;;  %v5217_v30 = vld [vmem:[#allocation5 + $0x36c] sm:$0xf]  ;;  %v3488_v37 = vld [vmem:[#allocation5 + $0x58] sm:$0xf0] }
  0xd6   :  { %1971 = vmatpush.bf16.msrb.mxu1 %v4127_v48  ;;  %1984 = vmatpush.bf16.msrb.mxu2 %v4255_v49  ;;  %v3936_v48 = vld [vmem:[#allocation5 + $0x3d8] sm:$0xf0]  ;;  %v1730_v49 = vpop.f32.mrf.mxu2  ;;  %v5117_v36 = vld [vmem:[#allocation5 + $0x4c] sm:$0xf] }
  0xd7   :  { %1997 = vmatpush.bf16.msrb.mxu3 %v4383_v55  ;;  %v3536_v55 = vld [vmem:[#allocation5 + $0xb8] sm:$0xf0]  ;;  %v3939_v57 = vor.u32 %v5229_v47, %v3936_v48  ;;  %v5181_v45 = vld [vmem:[#allocation5 + $0x24c] sm:$0xf]  ;;  %v3491_v51 = vor.u32 %v5117_v36, %v3488_v37 }
  0xd8   :  { %1959 = vmatpush.bf16.msrb.mxu0 %v3983_v62  ;;  %v3920_v62 = vld [vmem:[#allocation5 + $0x3b8] sm:$0xf0]  ;;  %v3539_v63 = vor.u32 %v5129_v54, %v3536_v55  ;;  %v5213_v49 = vld [vmem:[#allocation5 + $0x34c] sm:$0xf]  ;;  %v3619_v54 = vor.u32 %v5149_v39, %v3616_v43 }
  0xd9   :  { %v3923_v5 = vor.u32 %v5225_v61, %v3920_v62  ;;  %v3744_v46 = vld [vmem:[#allocation5 + $0x258] sm:$0xf0]  ;;  %v5113_v56 = vld [vmem:[#allocation5 + $0x2c] sm:$0xf] }
  0xda   :  { %1972 = vmatpush.bf16.msrb.mxu1 %v4111_v1  ;;  %1985 = vmatpush.bf16.msrb.mxu2 %v4239_v2  ;;  %v3795_v1 = vor.u32 %v5193_v59, %v3792_v60  ;;  %v5125_v2 = vld [vmem:[#allocation5 + $0x8c] sm:$0xf]  ;;  %v3747_v55 = vor.u32 %v5181_v45, %v3744_v46  ;;  %v3600_v61 = vld [vmem:[#allocation5 + $0x138] sm:$0xf0] }
  0xdb   :  { %1998 = vmatpush.bf16.msrb.mxu3 %v4367_v7  ;;  %v5189_v7 = vld [vmem:[#allocation5 + $0x28c] sm:$0xf]  ;;  %v3523_v11 = vor.u32 %v5125_v2, %v3520_v3  ;;  %v3456_v4 = vld [vmem:[#allocation5 + $0x18] sm:$0xf0] }
  0xdc   :  { %1960 = vmatpush.bf16.msrb.mxu0 %v3967_v16  ;;  %v3779_v14 = vor.u32 %v5189_v7, %v3776_v8  ;;  %v3504_v16 = vld [vmem:[#allocation5 + $0x78] sm:$0xf0]  ;;  %v5145_v58 = vld [vmem:[#allocation5 + $0x12c] sm:$0xf] }
  0xdd   :  { %v5177_v62 = vld [vmem:[#allocation5 + $0x22c] sm:$0xf]  ;;  %v3584_v8 = vld [vmem:[#allocation5 + $0x118] sm:$0xf0] }
  0xde   :  { %1973 = vmatpush.bf16.msrb.mxu1 %v4095_v27  ;;  %1986 = vmatpush.bf16.msrb.mxu2 %v4223_v28  ;;  %v1754_v12 = vpop.f32.mrf.mxu0  ;;  %v3632_v27 = vld [vmem:[#allocation5 + $0x178] sm:$0xf0]  ;;  %v5185_v28 = vld [vmem:[#allocation5 + $0x26c] sm:$0xf] }
  0xdf   :  { %1999 = vmatpush.bf16.msrb.mxu3 %v4351_v32  ;;  %1961 = vmatmul.bf16.vlgmr.msrb.gmra.mxu0 %v5798_v41  ;;  %v1755_v21 = vadd.f32 %v1754_v12, %v5823_v24  ;;  %v3891_v24 = vor.u32 %v5217_v30, %v3888_v31  ;;  %v5109_v3 = vld [vmem:[#allocation5 + $0xc] sm:$0xf]  ;;  %v3712_v12 = vld [vmem:[#allocation5 + $0x218] sm:$0xf0] }
  0xe0   :  { %2005 = vmatpush.bf16.msra.mxu0 %v3571_v33  ;;  %v1767_v23 = vpop.f32.mrf.mxu1  ;;  %v3507_v33 = vor.u32 %v5121_v15, %v3504_v16  ;;  %v5141_v7 = vld [vmem:[#allocation5 + $0x10c] sm:$0xf]  ;;  %v4064_v39 = vld [vmem:[#allocation5 + $0x4d8] sm:$0xf0] }
  0xe1   :  { %1987 = vmatmul.bf16.vlgmr.msrb.gmra.mxu2 %v5796_v38  ;;  %1974 = vmatmul.bf16.vlgmr.msrb.gmra.mxu1 %v5802_v44  ;;  %v1768_v32 = vadd.f32 %v1767_v23, %v1755_v21  ;;  %v5173_v9 = vld [vmem:[#allocation5 + $0x20c] sm:$0xf]  ;;  %v3459_v23 = vor.u32 %v5109_v3, %v3456_v4  ;;  %v4192_v43 = vld [vmem:[#allocation5 + $0x5d8] sm:$0xf0] }
  0xe2   :  { %2018 = vmatpush.bf16.msra.mxu1 %v3699_v34  ;;  %2031 = vmatpush.bf16.msra.mxu2 %v3827_v35  ;;  %v3635_v34 = vor.u32 %v5153_v17, %v3632_v27  ;;  %v3763_v35 = vor.u32 %v5185_v28, %v3760_v29  ;;  %v5265_v16 = vld [vmem:[#allocation5 + $0x4ec] sm:$0xf]  ;;  %v4080_v17 = vld [vmem:[#allocation5 + $0x4f8] sm:$0xf0]  ;;  %v3587_v29 = vor.u32 %v5141_v7, %v3584_v8 }
  0xe3   :  { %2044 = vmatpush.bf16.msra.mxu3 %v3955_v40  ;;  %v5297_v21 = vld [vmem:[#allocation5 + $0x5ec] sm:$0xf]  ;;  %v4336_v28 = vld [vmem:[#allocation5 + $0x6f8] sm:$0xf0]  ;;  %v3715_v30 = vor.u32 %v5173_v9, %v3712_v12 }
  0xe4   :  { %2000 = vmatmul.bf16.vlgmr.msrb.gmra.mxu3 %v5800_v42  ;;  %2006 = vmatpush.bf16.msra.mxu0 %v3555_v50  ;;  %v1780_v40 = vpop.f32.mrf.mxu2  ;;  %v3872_v50 = vld [vmem:[#allocation5 + $0x358] sm:$0xf0]  ;;  %v5329_v27 = vld [vmem:[#allocation5 + $0x6ec] sm:$0xf] }
  0xe5   :  { %v1781_v47 = vadd.f32 %v1780_v40, %v1768_v32  ;;  %v3875_v60 = vor.u32 %v5213_v49, %v3872_v50  ;;  %v5361_v31 = vld [vmem:[#allocation5 + $0x7ec] sm:$0xf]  ;;  %v4464_v32 = vld [vmem:[#allocation5 + $0x7f8] sm:$0xf0]  ;;  %v4339_v36 = vor.u32 %v5329_v27, %v4336_v28 }
  0xe6   :  { %2019 = vmatpush.bf16.msra.mxu1 %v3683_v52  ;;  %2032 = vmatpush.bf16.msra.mxu2 %v3811_v53  ;;  %v1756_v53 = vpop.f32.mrf.mxu0  ;;  %v5261_v37 = vld [vmem:[#allocation5 + $0x4cc] sm:$0xf]  ;;  %v4320_v46 = vld [vmem:[#allocation5 + $0x6d8] sm:$0xf0] }
  0xe7   :  { %2045 = vmatpush.bf16.msra.mxu3 %v3939_v57  ;;  %v1793_v48 = vpop.f32.mrf.mxu3  ;;  %v3472_v57 = vld [vmem:[#allocation5 + $0x38] sm:$0xf0]  ;;  %v5293_v40 = vld [vmem:[#allocation5 + $0x5cc] sm:$0xf]  ;;  %v4067_v49 = vor.u32 %v5261_v37, %v4064_v39 }
  0xe8   :  { %2007 = vmatpush.bf16.msra.mxu0 %v3539_v63  ;;  %v5830_v52 = vadd.f32 %v1793_v48, %v1781_v47  ;;  %v1769_v59 = vpop.f32.mrf.mxu1  ;;  %v3728_v63 = vld [vmem:[#allocation5 + $0x238] sm:$0xf0]  ;;  %v3475_v2 = vor.u32 %v5113_v56, %v3472_v57  ;;  %v5325_v45 = vld [vmem:[#allocation5 + $0x6cc] sm:$0xf]  ;;  %v4195_v50 = vor.u32 %v5293_v40, %v4192_v43 }
  0xe9   :  { %v3731_v6 = vor.u32 %v5177_v62, %v3728_v63  ;;  %v5357_v47 = vld [vmem:[#allocation5 + $0x7cc] sm:$0xf]  ;;  %v4448_v48 = vld [vmem:[#allocation5 + $0x7d8] sm:$0xf0] }
  0xea   :  { %2020 = vmatpush.bf16.msra.mxu1 %v3667_v0  ;;  %2033 = vmatpush.bf16.msra.mxu2 %v3795_v1  ;;  %v5209_v0 = vld [vmem:[#allocation5 + $0x32c] sm:$0xf]  ;;  %v3856_v1 = vld [vmem:[#allocation5 + $0x338] sm:$0xf0]  ;;  %v4451_v56 = vor.u32 %v5357_v47, %v4448_v48 }
  0xeb   :  { %2046 = vmatpush.bf16.msra.mxu3 %v3923_v5  ;;  %v3603_v5 = vor.u32 %v5145_v58, %v3600_v61  ;;  %v5257_v53 = vld [vmem:[#allocation5 + $0x4ac] sm:$0xf]  ;;  %v4176_v57 = vld [vmem:[#allocation5 + $0x5b8] sm:$0xf0] }
  0xec   :  { %2008 = vmatpush.bf16.msra.mxu0 %v3523_v11  ;;  %v1782_v10 = vpop.f32.mrf.mxu2  ;;  %v3859_v11 = vor.u32 %v5209_v0, %v3856_v1  ;;  %v5321_v58 = vld [vmem:[#allocation5 + $0x6ac] sm:$0xf]  ;;  %v4304_v59 = vld [vmem:[#allocation5 + $0x6b8] sm:$0xf0] }
  0xed   :  { %v4432_v61 = vld [vmem:[#allocation5 + $0x7b8] sm:$0xf0]  ;;  %v4307_v0 = vor.u32 %v5321_v58, %v4304_v59  ;;  %v5253_v1 = vld [vmem:[#allocation5 + $0x48c] sm:$0xf]  ;;  %v378_v58 = vperm.slane %v5820_v26, 1 }
  0xee   :  { %2021 = vmatpush.bf16.msra.mxu1 %v3651_v13  ;;  %2034 = vmatpush.bf16.msra.mxu2 %v3779_v14  ;;  %v5205_v13 = vld [vmem:[#allocation5 + $0x30c] sm:$0xf]  ;;  %v3840_v14 = vld [vmem:[#allocation5 + $0x318] sm:$0xf0]  ;;  %v5394_v26 = vld [vmem:[#allocation8 + $0xec] sm:$0xf0] }
  0xef   :  { %2047 = vmatpush.bf16.msra.mxu3 %v3907_v25  ;;  %v1795_v15 = vpop.f32.mrf.mxu3  ;;  %v4208_v25 = vld [vmem:[#allocation5 + $0x5f8] sm:$0xf0]  ;;  %v5349_v7 = vld [vmem:[#allocation5 + $0x78c] sm:$0xf] }
  0xf0   :  { %2009 = vmatpush.bf16.msra.mxu0 %v3507_v33  ;;  %v3843_v33 = vor.u32 %v5205_v13, %v3840_v14  ;;  %v4160_v4 = vld [vmem:[#allocation5 + $0x598] sm:$0xf0]  ;;  %v5249_v10 = vld [vmem:[#allocation5 + $0x46c] sm:$0xf] }
  0xf1   :  { %v5281_v12 = vld [vmem:[#allocation5 + $0x56c] sm:$0xf]  ;;  %v4144_v15 = vld [vmem:[#allocation5 + $0x578] sm:$0xf0] }
  0xf2   :  { %2022 = vmatpush.bf16.msra.mxu1 %v3635_v34  ;;  %2035 = vmatpush.bf16.msra.mxu2 %v3763_v35  ;;  %v4083_v34 = vor.u32 %v5265_v16, %v4080_v17  ;;  %v4211_v35 = vor.u32 %v5297_v21, %v4208_v25  ;;  %v5313_v16 = vld [vmem:[#allocation5 + $0x66c] sm:$0xf]  ;;  %v4272_v17 = vld [vmem:[#allocation5 + $0x678] sm:$0xf0]  ;;  %v4147_v27 = vor.u32 %v5281_v12, %v4144_v15 }
  0xf3   :  { %2048 = vmatpush.bf16.msra.mxu3 %v3891_v24  ;;  %v4467_v24 = vor.u32 %v5361_v31, %v4464_v32  ;;  %v5345_v21 = vld [vmem:[#allocation5 + $0x76c] sm:$0xf]  ;;  %v4275_v28 = vor.u32 %v5313_v16, %v4272_v17  ;;  %v4384_v40 = vld [vmem:[#allocation5 + $0x758] sm:$0xf0]  ;;  %v4838_v16 = vld [vmem:[#allocation8 + $0x2e0] sm:$0xf] }
  0xf4   :  { %2010 = vmatpush.bf16.msra.mxu0 %v3491_v51  ;;  %v4323_v51 = vor.u32 %v5325_v45, %v4320_v46  ;;  %v5277_v31 = vld [vmem:[#allocation5 + $0x54c] sm:$0xf]  ;;  %v3984_v48 = vld [vmem:[#allocation5 + $0x438] sm:$0xf0]  ;;  %v5458_v17 = vld [vmem:[#allocation8 + $0x2ec] sm:$0xf0] }
  0xf5   :  { %v5341_v39 = vld [vmem:[#allocation5 + $0x74c] sm:$0xf] }
  0xf6   :  { %2023 = vmatpush.bf16.msra.mxu1 %v3619_v54  ;;  %2036 = vmatpush.bf16.msra.mxu2 %v3747_v55  ;;  %v4048_v54 = vld [vmem:[#allocation5 + $0x4b8] sm:$0xf0]  ;;  %v5289_v55 = vld [vmem:[#allocation5 + $0x5ac] sm:$0xf] }
  0xf7   :  { %2049 = vmatpush.bf16.msra.mxu3 %v3875_v60  ;;  %v5353_v60 = vld [vmem:[#allocation5 + $0x7ac] sm:$0xf]  ;;  %v4051_v62 = vor.u32 %v5257_v53, %v4048_v54  ;;  %v4179_v63 = vor.u32 %v5289_v55, %v4176_v57  ;;  %v4112_v53 = vld [vmem:[#allocation5 + $0x538] sm:$0xf0] }
  0xf8   :  { %2011 = vmatpush.bf16.msra.mxu0 %v3475_v2  ;;  %v4032_v2 = vld [vmem:[#allocation5 + $0x498] sm:$0xf0]  ;;  %v4435_v3 = vor.u32 %v5353_v60, %v4432_v61  ;;  %v5241_v47 = vld [vmem:[#allocation5 + $0x42c] sm:$0xf] }
  0xf9   :  { %v5305_v54 = vld [vmem:[#allocation5 + $0x62c] sm:$0xf]  ;;  %v4240_v55 = vld [vmem:[#allocation5 + $0x638] sm:$0xf0]  ;;  %v3987_v59 = vor.u32 %v5241_v47, %v3984_v48  ;;  %v4534_v47 = vld [vmem:[#allocation8 + $0x80] sm:$0xf] }
  0xfa   :  { %2024 = vmatpush.bf16.msra.mxu1 %v3603_v5  ;;  %2037 = vmatpush.bf16.msra.mxu2 %v3731_v6  ;;  %v5317_v5 = vld [vmem:[#allocation5 + $0x68c] sm:$0xf]  ;;  %v4288_v6 = vld [vmem:[#allocation5 + $0x698] sm:$0xf0]  ;;  %v5382_v48 = vld [vmem:[#allocation8 + $0x8c] sm:$0xf0] }
  0xfb   :  { %2050 = vmatpush.bf16.msra.mxu3 %v3859_v11  ;;  %v4291_v9 = vor.u32 %v5317_v5, %v4288_v6  ;;  %v4016_v11 = vld [vmem:[#allocation5 + $0x478] sm:$0xf0]  ;;  %v5237_v60 = vld [vmem:[#allocation5 + $0x40c] sm:$0xf] }
  0xfc   :  { %2012 = vmatpush.bf16.msra.mxu0 %v3459_v23  ;;  %v5836_v8 = vpop.f32.mrf.mxu0  ;;  %v4400_v23 = vld [vmem:[#allocation5 + $0x778] sm:$0xf0]  ;;  %v4019_v25 = vor.u32 %v5249_v10, %v4016_v11  ;;  %v5333_v5 = vld [vmem:[#allocation5 + $0x70c] sm:$0xf]  ;;  %v5426_v10 = vld [vmem:[#allocation8 + $0x1ec] sm:$0xf0] }
  0xfd   :  { %v4368_v57 = vld [vmem:[#allocation5 + $0x738] sm:$0xf0] }
  0xfe   :  { %2025 = vmatpush.bf16.msra.mxu1 %v3587_v29  ;;  %2038 = vmatpush.bf16.msra.mxu2 %v3715_v30  ;;  %v5838_v13 = vpop.f32.mrf.mxu1  ;;  %v5245_v29 = vld [vmem:[#allocation5 + $0x44c] sm:$0xf]  ;;  %v4000_v30 = vld [vmem:[#allocation5 + $0x458] sm:$0xf0] }
  0xff   :  { %2051 = vmatpush.bf16.msra.mxu3 %v3843_v33  ;;  %2013 = vmatmul.bf16.vlgmr.msra.gmra.mxu0 %v5786_v19  ;;  %v4416_v19 = vld [vmem:[#allocation5 + $0x798] sm:$0xf0]  ;;  %v4403_v33 = vor.u32 %v5345_v21, %v4400_v23 }
 0x100   :  { %2057 = vmatpush.bf16.msrb.mxu0 %v4083_v34  ;;  %v4419_v14 = vor.u32 %v5349_v7, %v4416_v19  ;;  %v4128_v34 = vld [vmem:[#allocation5 + $0x558] sm:$0xf0]  ;;  %v4582_v19 = vld [vmem:[#allocation8 + $0xe0] sm:$0xf] }
 0x101   :  { %2039 = vmatmul.bf16.vlgmr.msra.gmra.mxu2 %v5784_v18  ;;  %2026 = vmatmul.bf16.vlgmr.msra.gmra.mxu1 %v5790_v22  ;;  %v5285_v18 = vld [vmem:[#allocation5 + $0x58c] sm:$0xf]  ;;  %v4131_v45 = vor.u32 %v5277_v31, %v4128_v34  ;;  %v4352_v7 = vld [vmem:[#allocation5 + $0x718] sm:$0xf0]  ;;  %v4583_v15 = vor.u32 %v5394_v26, %v4582_v19  ;;  %v4822_v31 = vld [vmem:[#allocation8 + $0x2c0] sm:$0xf] }
 0x102   :  { %2070 = vmatpush.bf16.msrb.mxu1 %v4211_v35  ;;  %2083 = vmatpush.bf16.msrb.mxu2 %v4339_v36  ;;  %v4163_v22 = vor.u32 %v5285_v18, %v4160_v4  ;;  %v5309_v35 = vld [vmem:[#allocation5 + $0x64c] sm:$0xf]  ;;  %v4256_v36 = vld [vmem:[#allocation5 + $0x658] sm:$0xf0] }
 0x103   :  { %2096 = vmatpush.bf16.msrb.mxu3 %v4467_v24  ;;  %v4003_v24 = vor.u32 %v5245_v29, %v4000_v30  ;;  %v4259_v46 = vor.u32 %v5309_v35, %v4256_v36  ;;  %v4224_v4 = vld [vmem:[#allocation5 + $0x618] sm:$0xf0]  ;;  %v4839_v29 = vor.u32 %v5458_v17, %v4838_v16  ;;  %v5386_v36 = vld [vmem:[#allocation8 + $0xac] sm:$0xf0] }
 0x104   :  { %2052 = vmatmul.bf16.vlgmr.msra.gmra.mxu3 %v5788_v20  ;;  %2058 = vmatpush.bf16.msrb.mxu0 %v4067_v49  ;;  %v4035_v20 = vor.u32 %v5253_v1, %v4032_v2  ;;  %v5840_v32 = vpop.f32.mrf.mxu2  ;;  %v1808_v43 = vpop.f32.mrf.mxu0  ;;  %v5273_v49 = vld [vmem:[#allocation5 + $0x52c] sm:$0xf]  ;;  %v4096_v1 = vld [vmem:[#allocation5 + $0x518] sm:$0xf0]  ;;  %v5402_v16 = vld [vmem:[#allocation8 + $0x12c] sm:$0xf0] }
 0x105   :  { %v4115_v61 = vor.u32 %v5273_v49, %v4112_v53  ;;  %v4662_v49 = vld [vmem:[#allocation8 + $0x180] sm:$0xf]  ;;  %v5446_v53 = vld [vmem:[#allocation8 + $0x28c] sm:$0xf0] }
 0x106   :  { %2071 = vmatpush.bf16.msrb.mxu1 %v4195_v50  ;;  %2084 = vmatpush.bf16.msrb.mxu2 %v4323_v51  ;;  %v1821_v50 = vpop.f32.mrf.mxu1  ;;  %v4387_v51 = vor.u32 %v5341_v39, %v4384_v40  ;;  %v4678_v39 = vld [vmem:[#allocation8 + $0x1a0] sm:$0xf]  ;;  %v5418_v40 = vld [vmem:[#allocation8 + $0x1ac] sm:$0xf0] }
 0x107   :  { %2097 = vmatpush.bf16.msrb.mxu3 %v4451_v56  ;;  %v5842_v37 = vpop.f32.mrf.mxu3  ;;  %v5337_v56 = vld [vmem:[#allocation5 + $0x72c] sm:$0xf]  ;;  %v4535_v50 = vor.u32 %v5382_v48, %v4534_v47  ;;  %v5456_v48 = vld [vmem:[#allocation8 + $0x2e4] sm:$0xf] }
 0x108   :  { %2059 = vmatpush.bf16.msrb.mxu0 %v4051_v62  ;;  %v4243_v62 = vor.u32 %v5305_v54, %v4240_v55  ;;  %v4371_v18 = vor.u32 %v5337_v56, %v4368_v57  ;;  %v4518_v55 = vld [vmem:[#allocation8 + $0x60] sm:$0xf]  ;;  %v5378_v56 = vld [vmem:[#allocation8 + $0x6c] sm:$0xf0] }
 0x10a   :  { %2072 = vmatpush.bf16.msrb.mxu1 %v4179_v63  ;;  %2085 = vmatpush.bf16.msrb.mxu2 %v4307_v0  ;;  %v3968_v63 = vld [vmem:[#allocation5 + $0x418] sm:$0xf0]  ;;  %v5269_v0 = vld [vmem:[#allocation5 + $0x50c] sm:$0xf] }
 0x10b   :  { %2098 = vmatpush.bf16.msrb.mxu3 %v4435_v3  ;;  %v5301_v3 = vld [vmem:[#allocation5 + $0x60c] sm:$0xf]  ;;  %v4099_v11 = vor.u32 %v5269_v0, %v4096_v1  ;;  %v5442_v0 = vld [vmem:[#allocation8 + $0x26c] sm:$0xf0] }
 0x10c   :  { %2060 = vmatpush.bf16.msrb.mxu0 %v4035_v20  ;;  %v1834_v2 = vpop.f32.mrf.mxu2  ;;  %v1807_v20 = vadd.f32 %v5836_v8, %v378_v58  ;;  %v4227_v12 = vor.u32 %v5301_v3, %v4224_v4  ;;  %v4694_v8 = vld [vmem:[#allocation8 + $0x1c0] sm:$0xf] }
 0x10d   :  { %v4502_v2 = vld [vmem:[#allocation8 + $0x40] sm:$0xf] }
 0x10e   :  { %2073 = vmatpush.bf16.msrb.mxu1 %v4163_v22  ;;  %2086 = vmatpush.bf16.msrb.mxu2 %v4291_v9  ;;  %v3971_v22 = vor.u32 %v5237_v60, %v3968_v63  ;;  %v4710_v9 = vld [vmem:[#allocation8 + $0x1e0] sm:$0xf]  ;;  %v1820_v23 = vadd.f32 %v5838_v13, %v1807_v20 }
 0x10f   :  { %2099 = vmatpush.bf16.msrb.mxu3 %v4419_v14  ;;  %v1847_v6 = vpop.f32.mrf.mxu3  ;;  %v4355_v14 = vor.u32 %v5333_v5, %v4352_v7  ;;  %v4711_v21 = vor.u32 %v5426_v10, %v4710_v9  ;;  %v4550_v13 = vld [vmem:[#allocation8 + $0xa0] sm:$0xf]  ;;  %v5406_v5 = vld [vmem:[#allocation8 + $0x14c] sm:$0xf0] }
 0x110   :  { %2061 = vmatpush.bf16.msrb.mxu0 %v4019_v25  ;;  %v4566_v25 = vld [vmem:[#allocation8 + $0xc0] sm:$0xf]  ;;  %v1833_v35 = vadd.f32 %v5840_v32, %v1820_v23  ;;  %v4551_v43 = vor.u32 %v5386_v36, %v4550_v13  ;;  %v4679_v32 = vor.u32 %v5418_v40, %v4678_v39  ;;  %v5438_v9 = vld [vmem:[#allocation8 + $0x24c] sm:$0xf0]  ;;  %v5424_v36 = vld [vmem:[#allocation8 + $0x1e4] sm:$0xf] }
 0x111   :  { %v4774_v63 = vld [vmem:[#allocation8 + $0x260] sm:$0xf]  ;;  %v4712_v39 = vld [vmem:[#allocation8 + $0x1f0] sm:$0xf0] }
 0x112   :  { %2074 = vmatpush.bf16.msrb.mxu1 %v4147_v27  ;;  %2087 = vmatpush.bf16.msrb.mxu2 %v4275_v28  ;;  %v5390_v27 = vld [vmem:[#allocation8 + $0xcc] sm:$0xf0]  ;;  %v4630_v4 = vld [vmem:[#allocation8 + $0x140] sm:$0xf]  ;;  %v4775_v7 = vor.u32 %v5442_v0, %v4774_v63 }
 0x113   :  { %2100 = vmatpush.bf16.msrb.mxu3 %v4403_v33  ;;  %v5422_v28 = vld [vmem:[#allocation8 + $0x1cc] sm:$0xf0]  ;;  %v4567_v30 = vor.u32 %v5390_v27, %v4566_v25  ;;  %v4631_v10 = vor.u32 %v5406_v5, %v4630_v4  ;;  %v4742_v25 = vld [vmem:[#allocation8 + $0x220] sm:$0xf]  ;;  %v4536_v4 = vld [vmem:[#allocation8 + $0x90] sm:$0xf0] }
 0x114   :  { %2062 = vmatpush.bf16.msrb.mxu0 %v4003_v24  ;;  %v5454_v33 = vld [vmem:[#allocation8 + $0x2cc] sm:$0xf0]  ;;  %v4695_v34 = vor.u32 %v5422_v28, %v4694_v8  ;;  %v4470_v28 = vld [vmem:[#allocation8] sm:$0xf]  ;;  %v5412_v5 = vld [vmem:[#allocation8 + $0x184] sm:$0xf] }
 0x115   :  { %v4823_v24 = vor.u32 %v5454_v33, %v4822_v31  ;;  %v5434_v27 = vld [vmem:[#allocation8 + $0x22c] sm:$0xf0] }
 0x116   :  { %2075 = vmatpush.bf16.msrb.mxu1 %v4131_v45  ;;  %2088 = vmatpush.bf16.msrb.mxu2 %v4259_v46  ;;  %v4806_v45 = vld [vmem:[#allocation8 + $0x2a0] sm:$0xf]  ;;  %v5450_v46 = vld [vmem:[#allocation8 + $0x2ac] sm:$0xf0]  ;;  %v4743_v40 = vor.u32 %v5434_v27, %v4742_v25  ;;  %v5372_v27 = vld [vmem:[#allocation8 + $0x44] sm:$0xf] }
 0x117   :  { %2101 = vmatpush.bf16.msrb.mxu3 %v4387_v51  ;;  %v5398_v33 = vld [vmem:[#allocation8 + $0x10c] sm:$0xf0] }
 0x118   :  { %2063 = vmatpush.bf16.msrb.mxu0 %v3987_v59  ;;  %v4646_v59 = vld [vmem:[#allocation8 + $0x160] sm:$0xf] }
 0x11a   :  { %2076 = vmatpush.bf16.msrb.mxu1 %v4115_v61  ;;  %2089 = vmatpush.bf16.msrb.mxu2 %v4243_v62  ;;  %v4519_v61 = vor.u32 %v5378_v56, %v4518_v55 }
 0x11b   :  { %2102 = vmatpush.bf16.msrb.mxu3 %v4371_v18  ;;  %v5374_v18 = vld [vmem:[#allocation8 + $0x4c] sm:$0xf0] }
 0x11c   :  { %2064 = vmatpush.bf16.msrb.mxu0 %v3971_v22  ;;  %v1858_v51 = vpop.f32.mrf.mxu0  ;;  %v4503_v19 = vor.u32 %v5374_v18, %v4502_v2  ;;  %v4758_v22 = vld [vmem:[#allocation8 + $0x240] sm:$0xf]  ;;  %v4808_v2 = vld [vmem:[#allocation8 + $0x2b0] sm:$0xf0] }
 0x11d   :  { %v4759_v17 = vor.u32 %v5438_v9, %v4758_v22  ;;  %v5376_v9 = vld [vmem:[#allocation8 + $0x64] sm:$0xf] }
 0x11e   :  { %2077 = vmatpush.bf16.msrb.mxu1 %v4099_v11  ;;  %2090 = vmatpush.bf16.msrb.mxu2 %v4227_v12  ;;  %v1871_v58 = vpop.f32.mrf.mxu1  ;;  %v4486_v11 = vld [vmem:[#allocation8 + $0x20] sm:$0xf]  ;;  %v5370_v12 = vld [vmem:[#allocation8 + $0x2c] sm:$0xf0] }
 0x11f   :  { %2103 = vmatpush.bf16.msrb.mxu3 %v4355_v14  ;;  %2065 = vmatmul.bf16.vlgmr.msrb.gmra.mxu0 %v5798_v41  ;;  %v1846_v41 = vadd.f32 %v5842_v37, %v1833_v35  ;;  %v5410_v37 = vld [vmem:[#allocation8 + $0x16c] sm:$0xf0]  ;;  %v4487_v23 = vor.u32 %v5370_v12, %v4486_v11  ;;  %v4584_v35 = vld [vmem:[#allocation8 + $0xf0] sm:$0xf0]  ;;  %v5408_v12 = vld [vmem:[#allocation8 + $0x164] sm:$0xf] }
 0x120   :  { %2895 = vmatpush.bf16.msra.mxu0 %v4583_v15  ;;  %v4647_v1 = vor.u32 %v5410_v37, %v4646_v59  ;;  %v4614_v15 = vld [vmem:[#allocation8 + $0x120] sm:$0xf]  ;;  %v5384_v37 = vld [vmem:[#allocation8 + $0xa4] sm:$0xf] }
 0x121   :  { %2078 = vmatmul.bf16.vlgmr.msrb.gmra.mxu1 %v5802_v44  ;;  %2091 = vmatmul.bf16.vlgmr.msrb.gmra.mxu2 %v5796_v38  ;;  %v5414_v44 = vld [vmem:[#allocation8 + $0x18c] sm:$0xf0]  ;;  %v4807_v38 = vor.u32 %v5450_v46, %v4806_v45  ;;  %v1859_v57 = vadd.f32 %v1858_v51, %v1846_v41  ;;  %v4615_v8 = vor.u32 %v5402_v16, %v4614_v15  ;;  %v4726_v45 = vld [vmem:[#allocation8 + $0x200] sm:$0xf]  ;;  %v2109_v41 = vmax.f32 %v5830_v52, 0.0 }
 0x122   :  { %2908 = vmatpush.bf16.msra.mxu1 %v4711_v21  ;;  %2104 = vmatmul.bf16.vlgmr.msrb.gmra.mxu3 %v5800_v42  ;;  %v4790_v42 = vld [vmem:[#allocation8 + $0x280] sm:$0xf]  ;;  %v4663_v54 = vor.u32 %v5414_v44, %v4662_v49  ;;  %v5430_v46 = vld [vmem:[#allocation8 + $0x20c] sm:$0xf0]  ;;  %v4840_v49 = vld [vmem:[#allocation8 + $0x2f0] sm:$0xf0]  ;;  %v4715_v44 = vor.u32 %v5424_v36, %v4712_v39 }
 0x123   :  { %2921 = vmatpush.bf16.msra.mxu2 %v4839_v29  ;;  %v4791_v60 = vor.u32 %v5446_v53, %v4790_v42  ;;  %v1872_v62 = vadd.f32 %v1871_v58, %v1859_v57  ;;  %v5366_v29 = vld [vmem:[#allocation8 + $0xc] sm:$0xf0]  ;;  %v5420_v51 = vld [vmem:[#allocation8 + $0x1c4] sm:$0xf]  ;;  %v4696_v42 = vld [vmem:[#allocation8 + $0x1d0] sm:$0xf0]  ;;  %v4727_v53 = vor.u32 %v5430_v46, %v4726_v45  ;;  %v4843_v55 = vor.u32 %v5456_v48, %v4840_v49 }
 0x124   :  { %2896 = vmatpush.bf16.msra.mxu0 %v4567_v30  ;;  %v1884_v3 = vpop.f32.mrf.mxu2  ;;  %v1860_v20 = vpop.f32.mrf.mxu0  ;;  %v4598_v30 = vld [vmem:[#allocation8 + $0x100] sm:$0xf]  ;;  %v5856_v56 = vpack.c.bf16 %v2109_v41, %v2109_v41  ;;  %v5452_v57 = vld [vmem:[#allocation8 + $0x2c4] sm:$0xf]  ;;  %v4824_v58 = vld [vmem:[#allocation8 + $0x2d0] sm:$0xf0]  ;;  %v4699_v59 = vor.u32 %v5420_v51, %v4696_v42 }
 0x125   :  { %v1885_v26 = vadd.f32 %v1884_v3, %v1872_v62  ;;  %v4680_v62 = vld [vmem:[#allocation8 + $0x1b0] sm:$0xf0]  ;;  %v4827_v63 = vor.u32 %v5452_v57, %v4824_v58  ;;  %v5380_v3 = vld [vmem:[#allocation8 + $0x84] sm:$0xf]  ;;  %v5866_v41 = vld [vmem:[#allocation7] sm:$0xf] }
 0x126   :  { %2909 = vmatpush.bf16.msra.mxu1 %v4695_v34  ;;  %v1873_v14 = vpop.f32.mrf.mxu1  ;;  %v5392_v34 = vld [vmem:[#allocation8 + $0xe4] sm:$0xf]  ;;  %v4792_v20 = vld [vmem:[#allocation8 + $0x290] sm:$0xf0]  ;;  %v4590_v57 = vld [vmem:[#allocation8 + $0xe8] sm:$0xf] }
 0x127   :  { %2922 = vmatpush.bf16.msra.mxu2 %v4823_v24  ;;  %v1897_v6 = vpop.f32.mrf.mxu3  ;;  %v4587_v47 = vor.u32 %v5392_v34, %v4584_v35  ;;  %v4648_v14 = vld [vmem:[#allocation8 + $0x170] sm:$0xf0]  ;;  %v5436_v35 = vld [vmem:[#allocation8 + $0x244] sm:$0xf]  ;;  %v5395_v58 = vld [vmem:[#allocation8 + $0xf4] sm:$0xf0] }
 0x128   :  { %2897 = vmatpush.bf16.msra.mxu0 %v4551_v43  ;;  %v1898_v21 = vadd.f32 %v1897_v6, %v1885_v26  ;;  %v4471_v43 = vor.u32 %v5366_v29, %v4470_v28  ;;  %v4664_v6 = vld [vmem:[#allocation8 + $0x190] sm:$0xf0]  ;;  %v5444_v26 = vld [vmem:[#allocation8 + $0x284] sm:$0xf]  ;;  %v4651_v25 = vor.u32 %v5408_v12, %v4648_v14  ;;  %v4934_v14 = vld [vmem:[#allocation8 + $0x3a0] sm:$0xf] }
 0x129   :  { %v4667_v22 = vor.u32 %v5412_v5, %v4664_v6  ;;  %v4795_v16 = vor.u32 %v5444_v26, %v4792_v20  ;;  %v5404_v28 = vld [vmem:[#allocation8 + $0x144] sm:$0xf]  ;;  %v4632_v29 = vld [vmem:[#allocation8 + $0x150] sm:$0xf0]  ;;  %v4950_v5 = vld [vmem:[#allocation8 + $0x3c0] sm:$0xf] }
 0x12a   :  { %2910 = vmatpush.bf16.msra.mxu1 %v4679_v32  ;;  %v2110_v24 = vmax.f32 %v1898_v21, 0.0  ;;  %v4599_v32 = vor.u32 %v5398_v33, %v4598_v30  ;;  %v5440_v21 = vld [vmem:[#allocation8 + $0x264] sm:$0xf]  ;;  %v4635_v36 = vor.u32 %v5404_v28, %v4632_v29  ;;  %v4616_v45 = vld [vmem:[#allocation8 + $0x130] sm:$0xf0] }
 0x12b   :  { %2923 = vmatpush.bf16.msra.mxu2 %v4807_v38  ;;  %v5388_v38 = vld [vmem:[#allocation8 + $0xc4] sm:$0xf]  ;;  %v5486_v6 = vld [vmem:[#allocation8 + $0x3cc] sm:$0xf0]  ;;  %v5391_v26 = vld [vmem:[#allocation8 + $0xd4] sm:$0xf0] }
 0x12c   :  { %2898 = vmatpush.bf16.msra.mxu0 %v4535_v50  ;;  %v1886_v31 = vpop.f32.mrf.mxu2  ;;  %v4568_v50 = vld [vmem:[#allocation8 + $0xd0] sm:$0xf0]  ;;  %v5368_v39 = vld [vmem:[#allocation8 + $0x24] sm:$0xf]  ;;  %v4951_v20 = vor.u32 %v5486_v6, %v4950_v5  ;;  %v4918_v29 = vld [vmem:[#allocation8 + $0x380] sm:$0xf] }
 0x12d   :  { %v4571_v52 = vor.u32 %v5388_v38, %v4568_v50  ;;  %v5432_v38 = vld [vmem:[#allocation8 + $0x224] sm:$0xf]  ;;  %v4744_v50 = vld [vmem:[#allocation8 + $0x230] sm:$0xf0]  ;;  %v4622_v5 = vld [vmem:[#allocation8 + $0x128] sm:$0xf] }
 0x12e   :  { %2911 = vmatpush.bf16.msra.mxu1 %v4663_v54  ;;  %v5854_v54 = vpack.c.bf16 %v2110_v24, %v2110_v24  ;;  %v5396_v42 = vld [vmem:[#allocation8 + $0x104] sm:$0xf] }
 0x12f   :  { %2924 = vmatpush.bf16.msra.mxu2 %v4791_v60  ;;  %v1899_v13 = vpop.f32.mrf.mxu3  ;;  %v4552_v60 = vld [vmem:[#allocation8 + $0xb0] sm:$0xf0] }
 0x130   :  { %2899 = vmatpush.bf16.msra.mxu0 %v4519_v61  ;;  %v5416_v61 = vld [vmem:[#allocation8 + $0x1a4] sm:$0xf]  ;;  %v4555_v0 = vor.u32 %v5384_v37, %v4552_v60  ;;  %v4760_v13 = vld [vmem:[#allocation8 + $0x250] sm:$0xf0]  ;;  %v4718_v60 = vld [vmem:[#allocation8 + $0x1e8] sm:$0xf] }
 0x131   :  { %v4683_v18 = vor.u32 %v5416_v61, %v4680_v62  ;;  %v4763_v48 = vor.u32 %v5436_v35, %v4760_v13  ;;  %v5427_v61 = vld [vmem:[#allocation8 + $0x1f4] sm:$0xf0]  ;;  %v4542_v35 = vld [vmem:[#allocation8 + $0x88] sm:$0xf] }
 0x132   :  { %2912 = vmatpush.bf16.msra.mxu1 %v4647_v1  ;;  %v5448_v1 = vld [vmem:[#allocation8 + $0x2a4] sm:$0xf]  ;;  %v5383_v13 = vld [vmem:[#allocation8 + $0x94] sm:$0xf0] }
 0x133   :  { %2925 = vmatpush.bf16.msra.mxu2 %v4775_v7  ;;  %v4811_v7 = vor.u32 %v5448_v1, %v4808_v2  ;;  %v5428_v2 = vld [vmem:[#allocation8 + $0x204] sm:$0xf] }
 0x134   :  { %2900 = vmatpush.bf16.msra.mxu0 %v4503_v19  ;;  %v4539_v19 = vor.u32 %v5380_v3, %v4536_v4  ;;  %v4591_v4 = vor.u32 %v5395_v58, %v4590_v57  ;;  %v4510_v57 = vld [vmem:[#allocation8 + $0x48] sm:$0xf]  ;;  %v5375_v58 = vld [vmem:[#allocation8 + $0x54] sm:$0xf0] }
 0x136   :  { %2913 = vmatpush.bf16.msra.mxu1 %v4631_v10  ;;  %v4520_v10 = vld [vmem:[#allocation8 + $0x70] sm:$0xf0] }
 0x137   :  { %2926 = vmatpush.bf16.msra.mxu2 %v4759_v17  ;;  %v4523_v17 = vor.u32 %v5376_v9, %v4520_v10  ;;  %v5423_v9 = vld [vmem:[#allocation8 + $0x1d4] sm:$0xf0] }
 0x138   :  { %2901 = vmatpush.bf16.msra.mxu0 %v4487_v23  ;;  %v4776_v23 = vld [vmem:[#allocation8 + $0x270] sm:$0xf0] }
 0x139   :  { %v4779_v33 = vor.u32 %v5440_v21, %v4776_v23  ;;  %v4558_v21 = vld [vmem:[#allocation8 + $0xa8] sm:$0xf]  ;;  %v5387_v23 = vld [vmem:[#allocation8 + $0xb4] sm:$0xf0] }
 0x13a   :  { %2914 = vmatpush.bf16.msra.mxu1 %v4615_v8  ;;  %v4504_v8 = vld [vmem:[#allocation8 + $0x50] sm:$0xf0] }
 0x13b   :  { %2927 = vmatpush.bf16.msra.mxu2 %v4743_v40  ;;  %v4507_v34 = vor.u32 %v5372_v27, %v4504_v8  ;;  %v4488_v40 = vld [vmem:[#allocation8 + $0x30] sm:$0xf0]  ;;  %v4686_v27 = vld [vmem:[#allocation8 + $0x1a8] sm:$0xf]  ;;  %v5419_v8 = vld [vmem:[#allocation8 + $0x1b4] sm:$0xf0] }
 0x13c   :  { %2902 = vmatpush.bf16.msra.mxu0 %v4471_v43  ;;  %v1910_v11 = vpop.f32.mrf.mxu0  ;;  %v5400_v43 = vld [vmem:[#allocation8 + $0x124] sm:$0xf]  ;;  %v4491_v49 = vor.u32 %v5368_v39, %v4488_v40  ;;  %v4670_v39 = vld [vmem:[#allocation8 + $0x188] sm:$0xf]  ;;  %v5415_v40 = vld [vmem:[#allocation8 + $0x194] sm:$0xf0] }
 0x13d   :  { %v4619_v51 = vor.u32 %v5400_v43, %v4616_v45  ;;  %v4543_v43 = vor.u32 %v5383_v13, %v4542_v35  ;;  %v5474_v45 = vld [vmem:[#allocation8 + $0x36c] sm:$0xf0]  ;;  %v4968_v35 = vld [vmem:[#allocation8 + $0x3f0] sm:$0xf0]  ;;  %v4720_v13 = vld [vmem:[#allocation8 + $0x1f8] sm:$0xf0] }
 0x13e   :  { %2915 = vmatpush.bf16.msra.mxu1 %v4599_v32  ;;  %v5860_v15 = vpop.f32.mrf.mxu1  ;;  %v379_v32 = vperm.slane %v5866_v41, 2 }
 0x13f   :  { %2903 = vmatmul.bf16.vlgmr.msra.gmra.mxu0 %v5856_v56  ;;  %2928 = vmatpush.bf16.msra.mxu2 %v4727_v53  ;;  %v4966_v53 = vld [vmem:[#allocation8 + $0x3e0] sm:$0xf] }
 0x140   :  { %2947 = vmatpush.bf16.msrb.mxu0 %v4587_v47  ;;  %v5364_v47 = vld [vmem:[#allocation8 + $0x4] sm:$0xf] }
 0x141   :  { %2916 = vmatmul.bf16.vlgmr.msra.gmra.mxu1 %v5854_v54 }
 0x142   :  { %2960 = vmatpush.bf16.msrb.mxu1 %v4715_v44  ;;  %v4472_v44 = vld [vmem:[#allocation8 + $0x10] sm:$0xf0] }
 0x143   :  { %2973 = vmatpush.bf16.msrb.mxu2 %v4843_v55  ;;  %v5490_v55 = vld [vmem:[#allocation8 + $0x3ec] sm:$0xf0]  ;;  %v4475_v1 = vor.u32 %v5364_v47, %v4472_v44  ;;  %v5379_v47 = vld [vmem:[#allocation8 + $0x74] sm:$0xf0]  ;;  %v4654_v44 = vld [vmem:[#allocation8 + $0x168] sm:$0xf] }
 0x144   :  { %2948 = vmatpush.bf16.msrb.mxu0 %v4571_v52  ;;  %v5862_v30 = vpop.f32.mrf.mxu2  ;;  %v1912_v24 = vpop.f32.mrf.mxu0  ;;  %v4600_v52 = vld [vmem:[#allocation8 + $0x110] sm:$0xf0]  ;;  %v4967_v37 = vor.u32 %v5490_v55, %v4966_v53  ;;  %v4886_v53 = vld [vmem:[#allocation8 + $0x340] sm:$0xf] }
 0x145   :  { %v4603_v3 = vor.u32 %v5396_v42, %v4600_v52 }
 0x146   :  { %2961 = vmatpush.bf16.msrb.mxu1 %v4699_v59  ;;  %v1925_v46 = vpop.f32.mrf.mxu1  ;;  %2934 = vmatpush.bf16.msra.mxu3 %v4967_v37  ;;  %v4638_v37 = vld [vmem:[#allocation8 + $0x148] sm:$0xf] }
 0x147   :  { %2974 = vmatpush.bf16.msrb.mxu2 %v4827_v63  ;;  %v5864_v31 = vpop.f32.mrf.mxu3  ;;  %v4747_v63 = vor.u32 %v5432_v38, %v4744_v50  ;;  %v4671_v46 = vor.u32 %v5415_v40, %v4670_v39  ;;  %v5411_v38 = vld [vmem:[#allocation8 + $0x174] sm:$0xf0] }
 0x148   :  { %2949 = vmatpush.bf16.msrb.mxu0 %v4555_v0  ;;  %v1911_v0 = vadd.f32 %v1910_v11, %v379_v32  ;;  %v4526_v32 = vld [vmem:[#allocation8 + $0x68] sm:$0xf]  ;;  %v4655_v52 = vor.u32 %v5411_v38, %v4654_v44  ;;  %v5455_v39 = vld [vmem:[#allocation8 + $0x2d4] sm:$0xf0]  ;;  %v5389_v44 = vld [vmem:[#allocation8 + $0xcc] sm:$0xf] }
 0x149   :  { %v4527_v42 = vor.u32 %v5379_v47, %v4526_v32  ;;  %v5484_v32 = vld [vmem:[#allocation8 + $0x3c4] sm:$0xf]  ;;  %v4952_v47 = vld [vmem:[#allocation8 + $0x3d0] sm:$0xf0]  ;;  %v4576_v38 = vld [vmem:[#allocation8 + $0xd8] sm:$0xf0] }
 0x14a   :  { %2962 = vmatpush.bf16.msrb.mxu1 %v4683_v18  ;;  %v4728_v18 = vld [vmem:[#allocation8 + $0x210] sm:$0xf0]  ;;  %v1924_v12 = vadd.f32 %v5860_v15, %v1911_v0  ;;  %2935 = vmatpush.bf16.msra.mxu3 %v4951_v20  ;;  %v4559_v15 = vor.u32 %v5387_v23, %v4558_v21  ;;  %v4511_v0 = vor.u32 %v5375_v58, %v4510_v57  ;;  %v5459_v20 = vld [vmem:[#allocation8 + $0x2f4] sm:$0xf0]  ;;  %v5462_v21 = vld [vmem:[#allocation8 + $0x30c] sm:$0xf0] }
 0x14b   :  { %2975 = vmatpush.bf16.msrb.mxu2 %v4811_v7  ;;  %v4719_v7 = vor.u32 %v5427_v61, %v4718_v60  ;;  %v4731_v10 = vor.u32 %v5428_v2, %v4728_v18  ;;  %v5407_v60 = vld [vmem:[#allocation8 + $0x154] sm:$0xf0]  ;;  %v5466_v2 = vld [vmem:[#allocation8 + $0x32c] sm:$0xf0]  ;;  %v4936_v57 = vld [vmem:[#allocation8 + $0x3b0] sm:$0xf0] }
 0x14c   :  { %2950 = vmatpush.bf16.msrb.mxu0 %v4539_v19  ;;  %v1938_v59 = vpop.f32.mrf.mxu2  ;;  %v4574_v19 = vld [vmem:[#allocation8 + $0xc8] sm:$0xf]  ;;  %v1937_v28 = vadd.f32 %v5862_v30, %v1924_v12  ;;  %v4902_v30 = vld [vmem:[#allocation8 + $0x360] sm:$0xf]  ;;  %v4639_v18 = vor.u32 %v5407_v60, %v4638_v37  ;;  %v5385_v37 = vld [vmem:[#allocation8 + $0xac] sm:$0xf] }
 0x14d   :  { %v4575_v11 = vor.u32 %v5391_v26, %v4574_v19  ;;  %v5403_v19 = vld [vmem:[#allocation8 + $0x134] sm:$0xf0]  ;;  %v4846_v26 = vld [vmem:[#allocation8 + $0x2e8] sm:$0xf]  ;;  %v4560_v60 = vld [vmem:[#allocation8 + $0xb8] sm:$0xf0] }
 0x14e   :  { %2963 = vmatpush.bf16.msrb.mxu1 %v4667_v22  ;;  %v4702_v22 = vld [vmem:[#allocation8 + $0x1c8] sm:$0xf]  ;;  %v1950_v24 = vadd.f32 %v5864_v31, %v1937_v28  ;;  %v5470_v31 = vld [vmem:[#allocation8 + $0x34c] sm:$0xf0]  ;;  %v4623_v23 = vor.u32 %v5403_v19, %v4622_v5  ;;  %v5413_v19 = vld [vmem:[#allocation8 + $0x18c] sm:$0xf] }
 0x14f   :  { %2976 = vmatpush.bf16.msrb.mxu2 %v4795_v16  ;;  %v1951_v62 = vpop.f32.mrf.mxu3  ;;  %v5482_v16 = vld [vmem:[#allocation8 + $0x3ac] sm:$0xf0]  ;;  %v4887_v59 = vor.u32 %v5470_v31, %v4886_v53  ;;  %v5451_v53 = vld [vmem:[#allocation8 + $0x2b4] sm:$0xf0]  ;;  %v4955_v31 = vor.u32 %v5484_v32, %v4952_v47 }
 0x150   :  { %2951 = vmatpush.bf16.msrb.mxu0 %v4523_v17  ;;  %v4703_v17 = vor.u32 %v5423_v9, %v4702_v22  ;;  %v4478_v9 = vld [vmem:[#allocation8 + $0x8] sm:$0xf] }
 0x152   :  { %2964 = vmatpush.bf16.msrb.mxu1 %v4651_v25  ;;  %v4935_v25 = vor.u32 %v5482_v16, %v4934_v14  ;;  %v4606_v16 = vld [vmem:[#allocation8 + $0x108] sm:$0xf] }
 0x153   :  { %2977 = vmatpush.bf16.msrb.mxu2 %v4779_v33  ;;  %v5478_v33 = vld [vmem:[#allocation8 + $0x38c] sm:$0xf0] }
 0x154   :  { %2952 = vmatpush.bf16.msrb.mxu0 %v4507_v34  ;;  %2936 = vmatpush.bf16.msra.mxu3 %v4935_v25  ;;  %v4687_v34 = vor.u32 %v5419_v8, %v4686_v27  ;;  %v4847_v25 = vor.u32 %v5459_v20, %v4846_v26  ;;  %v5399_v27 = vld [vmem:[#allocation8 + $0x114] sm:$0xf0]  ;;  %v5393_v8 = vld [vmem:[#allocation8 + $0xec] sm:$0xf]  ;;  %v4672_v26 = vld [vmem:[#allocation8 + $0x198] sm:$0xf0] }
 0x155   :  { %v4782_v20 = vld [vmem:[#allocation8 + $0x268] sm:$0xf] }
 0x156   :  { %2965 = vmatpush.bf16.msrb.mxu1 %v4635_v36  ;;  %v4919_v36 = vor.u32 %v5478_v33, %v4918_v29  ;;  %v4592_v33 = vld [vmem:[#allocation8 + $0xf8] sm:$0xf0] }
 0x157   :  { %2978 = vmatpush.bf16.msrb.mxu2 %v4763_v48  ;;  %v4903_v48 = vor.u32 %v5474_v45, %v4902_v30  ;;  %v4607_v45 = vor.u32 %v5399_v27, %v4606_v16  ;;  %v4766_v27 = vld [vmem:[#allocation8 + $0x248] sm:$0xf] }
 0x158   :  { %2953 = vmatpush.bf16.msrb.mxu0 %v4491_v49  ;;  %2937 = vmatpush.bf16.msra.mxu3 %v4919_v36  ;;  %v4830_v36 = vld [vmem:[#allocation8 + $0x2c8] sm:$0xf] }
 0x15a   :  { %2966 = vmatpush.bf16.msrb.mxu1 %v4619_v51 }
 0x15b   :  { %2979 = vmatpush.bf16.msrb.mxu2 %v4747_v63 }
 0x15c   :  { %2954 = vmatpush.bf16.msrb.mxu0 %v4475_v1  ;;  %v1962_v49 = vpop.f32.mrf.mxu0  ;;  %2938 = vmatpush.bf16.msra.mxu3 %v4903_v48  ;;  %v4870_v1 = vld [vmem:[#allocation8 + $0x320] sm:$0xf] }
 0x15d   :  { %v1963_v50 = vadd.f32 %v1962_v49, %v1950_v24  ;;  %v4871_v6 = vor.u32 %v5466_v2, %v4870_v1  ;;  %v4831_v49 = vor.u32 %v5455_v39, %v4830_v36  ;;  %v5476_v2 = vld [vmem:[#allocation8 + $0x384] sm:$0xf] }
 0x15e   :  { %2967 = vmatpush.bf16.msrb.mxu1 %v4603_v3  ;;  %v1975_v51 = vpop.f32.mrf.mxu1  ;;  %v4494_v3 = vld [vmem:[#allocation8 + $0x28] sm:$0xf] }
 0x15f   :  { %2955 = vmatmul.bf16.vlgmr.msrb.gmra.mxu0 %v5856_v56  ;;  %2980 = vmatpush.bf16.msrb.mxu2 %v4731_v10  ;;  %v1976_v55 = vadd.f32 %v1975_v51, %v1963_v50  ;;  %v5367_v10 = vld [vmem:[#allocation8 + $0x14] sm:$0xf0]  ;;  %v5421_v50 = vld [vmem:[#allocation8 + $0x1cc] sm:$0xf]  ;;  %v4704_v51 = vld [vmem:[#allocation8 + $0x1d8] sm:$0xf0] }
 0x160   :  { %2999 = vmatpush.bf16.msra.mxu0 %v4591_v4  ;;  %2939 = vmatpush.bf16.msra.mxu3 %v4887_v59  ;;  %v5371_v4 = vld [vmem:[#allocation8 + $0x34] sm:$0xf0]  ;;  %v4707_v58 = vor.u32 %v5421_v50, %v4704_v51 }
 0x161   :  { %2968 = vmatmul.bf16.vlgmr.msrb.gmra.mxu1 %v5854_v54  ;;  %v4495_v14 = vor.u32 %v5371_v4, %v4494_v3  ;;  %v4563_v3 = vor.u32 %v5385_v37, %v4560_v60  ;;  %v5457_v37 = vld [vmem:[#allocation8 + $0x2ec] sm:$0xf]  ;;  %v4848_v60 = vld [vmem:[#allocation8 + $0x2f8] sm:$0xf0] }
 0x162   :  { %3012 = vmatpush.bf16.msra.mxu1 %v4719_v7 }
 0x164   :  { %3000 = vmatpush.bf16.msra.mxu0 %v4575_v11  ;;  %v1988_v61 = vpop.f32.mrf.mxu2  ;;  %v1964_v22 = vpop.f32.mrf.mxu0  ;;  %2940 = vmatpush.bf16.msra.mxu3 %v4871_v6  ;;  %v5381_v6 = vld [vmem:[#allocation8 + $0x8c] sm:$0xf] }
 0x165   :  { %v1989_v62 = vadd.f32 %v1988_v61, %v1976_v55  ;;  %v4579_v55 = vor.u32 %v5389_v44, %v4576_v38  ;;  %v5417_v61 = vld [vmem:[#allocation8 + $0x1ac] sm:$0xf]  ;;  %v5443_v22 = vld [vmem:[#allocation8 + $0x274] sm:$0xf0]  ;;  %v4872_v44 = vld [vmem:[#allocation8 + $0x330] sm:$0xf0] }
 0x166   :  { %3013 = vmatpush.bf16.msra.mxu1 %v4703_v17  ;;  %v1977_v12 = vpop.f32.mrf.mxu1  ;;  %v4854_v17 = vld [vmem:[#allocation8 + $0x300] sm:$0xf]  ;;  %v4783_v16 = vor.u32 %v5443_v22, %v4782_v20  ;;  %v4832_v20 = vld [vmem:[#allocation8 + $0x2d8] sm:$0xf0] }
 0x167   :  { %v2001_v63 = vpop.f32.mrf.mxu3  ;;  %v4855_v28 = vor.u32 %v5462_v21, %v4854_v17  ;;  %v5472_v12 = vld [vmem:[#allocation8 + $0x364] sm:$0xf]  ;;  %v5377_v17 = vld [vmem:[#allocation8 + $0x6c] sm:$0xf]  ;;  %v4528_v21 = vld [vmem:[#allocation8 + $0x78] sm:$0xf0] }
 0x168   :  { %3001 = vmatpush.bf16.msra.mxu0 %v4559_v15  ;;  %v2002_v7 = vadd.f32 %v2001_v63, %v1989_v62  ;;  %v5488_v15 = vld [vmem:[#allocation8 + $0x3e4] sm:$0xf]  ;;  %v4688_v62 = vld [vmem:[#allocation8 + $0x1b8] sm:$0xf0]  ;;  %v4798_v63 = vld [vmem:[#allocation8 + $0x288] sm:$0xf] }
 0x169   :  { %2941 = vmatpush.bf16.msra.mxu3 %v4855_v28  ;;  %v4971_v24 = vor.u32 %v5488_v15, %v4968_v35  ;;  %v4691_v4 = vor.u32 %v5417_v61, %v4688_v62  ;;  %v5468_v35 = vld [vmem:[#allocation8 + $0x344] sm:$0xf] }
 0x16a   :  { %3014 = vmatpush.bf16.msra.mxu1 %v4687_v34  ;;  %v2111_v11 = vmax.f32 %v2002_v7, 0.0  ;;  %v5425_v34 = vld [vmem:[#allocation8 + $0x1ec] sm:$0xf]  ;;  %v4544_v7 = vld [vmem:[#allocation8 + $0x98] sm:$0xf0] }
 0x16b   :  { %v4723_v48 = vor.u32 %v5425_v34, %v4720_v13  ;;  %v4888_v13 = vld [vmem:[#allocation8 + $0x350] sm:$0xf0] }
 0x16c   :  { %3002 = vmatpush.bf16.msra.mxu0 %v4543_v43  ;;  %v5874_v29 = vpack.c.bf16 %v2111_v11, %v2111_v11  ;;  %v1990_v40 = vpop.f32.mrf.mxu2  ;;  %v4479_v43 = vor.u32 %v5367_v10, %v4478_v9  ;;  %v4547_v10 = vor.u32 %v5381_v6, %v4544_v7  ;;  %v4904_v11 = vld [vmem:[#allocation8 + $0x370] sm:$0xf0]  ;;  %v4891_v32 = vor.u32 %v5468_v35, %v4888_v13  ;;  %v4608_v6 = vld [vmem:[#allocation8 + $0x118] sm:$0xf0] }
 0x16d   :  { %2986 = vmatpush.bf16.msrb.mxu3 %v4971_v24  ;;  %v4907_v28 = vor.u32 %v5472_v12, %v4904_v11  ;;  %v5373_v40 = vld [vmem:[#allocation8 + $0x4c] sm:$0xf]  ;;  %v4512_v24 = vld [vmem:[#allocation8 + $0x58] sm:$0xf0] }
 0x16e   :  { %3015 = vmatpush.bf16.msra.mxu1 %v4671_v46  ;;  %2929 = vmatmul.bf16.vlgmr.msra.gmra.mxu2 %v5874_v29  ;;  %v4595_v46 = vor.u32 %v5393_v8, %v4592_v33  ;;  %v5439_v8 = vld [vmem:[#allocation8 + $0x254] sm:$0xf0]  ;;  %v4531_v33 = vor.u32 %v5377_v17, %v4528_v21  ;;  %v4515_v47 = vor.u32 %v5373_v40, %v4512_v24  ;;  %v4816_v17 = vld [vmem:[#allocation8 + $0x2b8] sm:$0xf0]  ;;  %v5433_v24 = vld [vmem:[#allocation8 + $0x22c] sm:$0xf] }
 0x16f   :  { %v2003_v30 = vpop.f32.mrf.mxu3  ;;  %3025 = vmatpush.bf16.msra.mxu2 %v4847_v25  ;;  %v4656_v25 = vld [vmem:[#allocation8 + $0x178] sm:$0xf0]  ;;  %v4767_v39 = vor.u32 %v5439_v8, %v4766_v27 }
 0x170   :  { %3003 = vmatpush.bf16.msra.mxu0 %v4527_v42  ;;  %v4814_v42 = vld [vmem:[#allocation8 + $0x2a8] sm:$0xf]  ;;  %v4640_v30 = vld [vmem:[#allocation8 + $0x158] sm:$0xf0] }
 0x171   :  { %v4815_v59 = vor.u32 %v5451_v53, %v4814_v42  ;;  %2987 = vmatpush.bf16.msrb.mxu3 %v4955_v31  ;;  %v5369_v42 = vld [vmem:[#allocation8 + $0x2c] sm:$0xf]  ;;  %v4496_v53 = vld [vmem:[#allocation8 + $0x38] sm:$0xf0] }
 0x172   :  { %3016 = vmatpush.bf16.msra.mxu1 %v4655_v52  ;;  %v5480_v52 = vld [vmem:[#allocation8 + $0x3a4] sm:$0xf]  ;;  %v5401_v31 = vld [vmem:[#allocation8 + $0x12c] sm:$0xf]  ;;  %v4499_v61 = vor.u32 %v5369_v42, %v4496_v53 }
 0x173   :  { %3026 = vmatpush.bf16.msra.mxu2 %v4831_v49  ;;  %v4939_v1 = vor.u32 %v5480_v52, %v4936_v57  ;;  %v5464_v49 = vld [vmem:[#allocation8 + $0x324] sm:$0xf]  ;;  %v4734_v52 = vld [vmem:[#allocation8 + $0x208] sm:$0xf]  ;;  %v5431_v57 = vld [vmem:[#allocation8 + $0x214] sm:$0xf0] }
 0x174   :  { %3004 = vmatpush.bf16.msra.mxu0 %v4511_v0  ;;  %v5447_v0 = vld [vmem:[#allocation8 + $0x294] sm:$0xf0] }
 0x175   :  { %v4799_v5 = vor.u32 %v5447_v0, %v4798_v63  ;;  %2988 = vmatpush.bf16.msrb.mxu3 %v4939_v1  ;;  %v5460_v63 = vld [vmem:[#allocation8 + $0x304] sm:$0xf]  ;;  %v4856_v0 = vld [vmem:[#allocation8 + $0x310] sm:$0xf0] }
 0x176   :  { %3017 = vmatpush.bf16.msra.mxu1 %v4639_v18  ;;  %v4920_v18 = vld [vmem:[#allocation8 + $0x390] sm:$0xf0]  ;;  %v4859_v7 = vor.u32 %v5460_v63, %v4856_v0  ;;  %v4926_v63 = vld [vmem:[#allocation8 + $0x388] sm:$0xf]  ;;  %v5479_v0 = vld [vmem:[#allocation8 + $0x394] sm:$0xf0] }
 0x177   :  { %3027 = vmatpush.bf16.msra.mxu2 %v4815_v59  ;;  %v4923_v9 = vor.u32 %v5476_v2, %v4920_v18  ;;  %v4735_v2 = vor.u32 %v5431_v57, %v4734_v52  ;;  %v5365_v18 = vld [vmem:[#allocation8 + $0xc] sm:$0xf]  ;;  %v4958_v52 = vld [vmem:[#allocation8 + $0x3c8] sm:$0xf]  ;;  %v5487_v57 = vld [vmem:[#allocation8 + $0x3d4] sm:$0xf0] }
 0x178   :  { %3005 = vmatpush.bf16.msra.mxu0 %v4495_v14  ;;  %v4675_v14 = vor.u32 %v5413_v19, %v4672_v26  ;;  %v380_v19 = vperm.slane %v5866_v41, 3  ;;  %v5453_v26 = vld [vmem:[#allocation8 + $0x2cc] sm:$0xf] }
 0x179   :  { %2989 = vmatpush.bf16.msrb.mxu3 %v4923_v9  ;;  %v4835_v11 = vor.u32 %v5453_v26, %v4832_v20 }
 0x17a   :  { %3018 = vmatpush.bf16.msra.mxu1 %v4623_v23  ;;  %v5409_v23 = vld [vmem:[#allocation8 + $0x16c] sm:$0xf] }
 0x17b   :  { %3028 = vmatpush.bf16.msra.mxu2 %v4799_v5  ;;  %v4659_v36 = vor.u32 %v5409_v23, %v4656_v25  ;;  %v5397_v5 = vld [vmem:[#allocation8 + $0x10c] sm:$0xf]  ;;  %v4800_v25 = vld [vmem:[#allocation8 + $0x298] sm:$0xf0] }
 0x17c   :  { %3006 = vmatpush.bf16.msra.mxu0 %v4479_v43  ;;  %v5880_v15 = vpop.f32.mrf.mxu0  ;;  %v5405_v43 = vld [vmem:[#allocation8 + $0x14c] sm:$0xf] }
 0x17d   :  { %2990 = vmatpush.bf16.msrb.mxu3 %v4907_v28  ;;  %v4643_v38 = vor.u32 %v5405_v43, %v4640_v30  ;;  %v5445_v23 = vld [vmem:[#allocation8 + $0x28c] sm:$0xf]  ;;  %v4752_v43 = vld [vmem:[#allocation8 + $0x238] sm:$0xf0] }
 0x17e   :  { %3019 = vmatpush.bf16.msra.mxu1 %v4607_v45  ;;  %2981 = vmatmul.bf16.vlgmr.msrb.gmra.mxu2 %v5874_v29  ;;  %v5882_v34 = vpop.f32.mrf.mxu1  ;;  %v4750_v45 = vld [vmem:[#allocation8 + $0x228] sm:$0xf]  ;;  %v4803_v27 = vor.u32 %v5445_v23, %v4800_v25  ;;  %v5441_v28 = vld [vmem:[#allocation8 + $0x26c] sm:$0xf] }
 0x17f   :  { %3007 = vmatmul.bf16.vlgmr.msra.gmra.mxu0 %v5856_v56  ;;  %3029 = vmatpush.bf16.msra.mxu2 %v4783_v16  ;;  %v5449_v16 = vld [vmem:[#allocation8 + $0x2ac] sm:$0xf] }
 0x180   :  { %3051 = vmatpush.bf16.msrb.mxu0 %v4595_v46  ;;  %v5435_v46 = vld [vmem:[#allocation8 + $0x234] sm:$0xf0]  ;;  %v4819_v41 = vor.u32 %v5449_v16, %v4816_v17 }
 0x181   :  { %3020 = vmatmul.bf16.vlgmr.msra.gmra.mxu1 %v5854_v54  ;;  %v4751_v50 = vor.u32 %v5435_v46, %v4750_v45  ;;  %2991 = vmatpush.bf16.msrb.mxu3 %v4891_v32  ;;  %v4755_v45 = vor.u32 %v5433_v24, %v4752_v43  ;;  %v5463_v16 = vld [vmem:[#allocation8 + $0x314] sm:$0xf0] }
 0x182   :  { %3064 = vmatpush.bf16.msrb.mxu1 %v4723_v48 }
 0x183   :  { %3030 = vmatpush.bf16.msra.mxu2 %v4767_v39  ;;  %v4768_v39 = vld [vmem:[#allocation8 + $0x258] sm:$0xf0] }
 0x184   :  { %3052 = vmatpush.bf16.msrb.mxu0 %v4579_v55  ;;  %v5884_v48 = vpop.f32.mrf.mxu2  ;;  %v4624_v55 = vld [vmem:[#allocation8 + $0x138] sm:$0xf0]  ;;  %v2016_v59 = vpop.f32.mrf.mxu0 }
 0x185   :  { %v4627_v1 = vor.u32 %v5401_v31, %v4624_v55 }
 0x186   :  { %3065 = vmatpush.bf16.msrb.mxu1 %v4707_v58  ;;  %v4875_v58 = vor.u32 %v5464_v49, %v4872_v44  ;;  %v2029_v62 = vpop.f32.mrf.mxu1  ;;  %v4736_v49 = vld [vmem:[#allocation8 + $0x218] sm:$0xf0] }
 0x187   :  { %v2053_v51 = vpop.f32.mrf.mxu3  ;;  %3031 = vmatpush.bf16.msra.mxu2 %v4751_v50  ;;  %v4974_v50 = vld [vmem:[#allocation8 + $0x3e8] sm:$0xf] }
 0x188   :  { %3053 = vmatpush.bf16.msrb.mxu0 %v4563_v3  ;;  %v4480_v3 = vld [vmem:[#allocation8 + $0x18] sm:$0xf0]  ;;  %2992 = vmatpush.bf16.msrb.mxu3 %v4875_v58 }
 0x189   :  { %v4483_v22 = vor.u32 %v5365_v18, %v4480_v3  ;;  %v4910_v18 = vld [vmem:[#allocation8 + $0x368] sm:$0xf]  ;;  %v5475_v3 = vld [vmem:[#allocation8 + $0x374] sm:$0xf0] }
 0x18a   :  { %3066 = vmatpush.bf16.msrb.mxu1 %v4691_v4  ;;  %v4851_v4 = vor.u32 %v5457_v37, %v4848_v60  ;;  %v4959_v37 = vor.u32 %v5487_v57, %v4958_v52  ;;  %v4942_v60 = vld [vmem:[#allocation8 + $0x3a8] sm:$0xf] }
 0x18b   :  { %3032 = vmatpush.bf16.msra.mxu2 %v4735_v2  ;;  %v4927_v2 = vor.u32 %v5479_v0, %v4926_v63  ;;  %v5497_v0 = vld [vmem:[#allocation11 + $0x28] sm:$0xff] }
 0x18c   :  { %3054 = vmatpush.bf16.msrb.mxu0 %v4547_v10  ;;  %v2042_v9 = vpop.f32.mrf.mxu2  ;;  %v4611_v10 = vor.u32 %v5397_v5, %v4608_v6  ;;  %2993 = vmatpush.bf16.msrb.mxu3 %v4859_v7  ;;  %v4911_v5 = vor.u32 %v5475_v3, %v4910_v18  ;;  %v4894_v7 = vld [vmem:[#allocation8 + $0x348] sm:$0xf]  ;;  %v5507_v18 = vld [vmem:[#allocation11 + $0x78] sm:$0xff] }
 0x18d   :  { %v4878_v9 = vld [vmem:[#allocation8 + $0x328] sm:$0xf] }
 0x18e   :  { %3067 = vmatpush.bf16.msrb.mxu1 %v4675_v14  ;;  %v2015_v14 = vadd.f32 %v5880_v15, %v380_v19  ;;  %3033 = vmatmul.bf16.vlgmr.msra.gmra.mxu2 %v5874_v29  ;;  %v4784_v15 = vld [vmem:[#allocation8 + $0x278] sm:$0xf0]  ;;  %v5471_v19 = vld [vmem:[#allocation8 + $0x354] sm:$0xf0]  ;;  %v5496_v3 = vld [vmem:[#allocation11 + $0x20] sm:$0xff] }
 0x18f   :  { %v2055_v12 = vpop.f32.mrf.mxu3  ;;  %3077 = vmatpush.bf16.msrb.mxu2 %v4851_v4 }
 0x190   :  { %3055 = vmatpush.bf16.msrb.mxu0 %v4531_v33  ;;  %v2028_v21 = vadd.f32 %v5882_v34, %v2015_v14  ;;  %v4787_v33 = vor.u32 %v5441_v28, %v4784_v15  ;;  %v4862_v14 = vld [vmem:[#allocation8 + $0x308] sm:$0xf]  ;;  %v5481_v15 = vld [vmem:[#allocation8 + $0x3ac] sm:$0xf] }
 0x191   :  { %v4863_v23 = vor.u32 %v5463_v16, %v4862_v14 }
 0x192   :  { %3068 = vmatpush.bf16.msrb.mxu1 %v4659_v36  ;;  %v2041_v8 = vadd.f32 %v5884_v48, %v2028_v21  ;;  %v5437_v36 = vld [vmem:[#allocation8 + $0x24c] sm:$0xf]  ;;  %v4976_v21 = vld [vmem:[#allocation8 + $0x3f8] sm:$0xf0] }
 0x193   :  { %3078 = vmatpush.bf16.msrb.mxu2 %v4835_v11  ;;  %v5429_v48 = vld [vmem:[#allocation8 + $0x20c] sm:$0xf] }
 0x194   :  { %3056 = vmatpush.bf16.msrb.mxu0 %v4515_v47  ;;  %v2054_v35 = vadd.f32 %v2053_v51, %v2041_v8  ;;  %v5491_v51 = vld [vmem:[#allocation8 + $0x3f4] sm:$0xf0]  ;;  %v4739_v42 = vor.u32 %v5429_v48, %v4736_v49  ;;  %v4960_v8 = vld [vmem:[#allocation8 + $0x3d8] sm:$0xf0]  ;;  %v5465_v48 = vld [vmem:[#allocation8 + $0x32c] sm:$0xf] }
 0x195   :  { %v4975_v31 = vor.u32 %v5491_v51, %v4974_v50  ;;  %v4880_v49 = vld [vmem:[#allocation8 + $0x338] sm:$0xf0]  ;;  %v5461_v50 = vld [vmem:[#allocation8 + $0x30c] sm:$0xf] }
 0x196   :  { %3069 = vmatpush.bf16.msrb.mxu1 %v4643_v38  ;;  %v4864_v51 = vld [vmem:[#allocation8 + $0x318] sm:$0xf0] }
 0x197   :  { %3079 = vmatpush.bf16.msrb.mxu2 %v4819_v41  ;;  %v5489_v41 = vld [vmem:[#allocation8 + $0x3ec] sm:$0xf] }
 0x198   :  { %3057 = vmatpush.bf16.msrb.mxu0 %v4499_v61  ;;  %v5483_v61 = vld [vmem:[#allocation8 + $0x3b4] sm:$0xf0]  ;;  %v4979_v25 = vor.u32 %v5489_v41, %v4976_v21  ;;  %v5515_v41 = vld [vmem:[#allocation11 + $0xb8] sm:$0xff] }
 0x199   :  { %v4943_v62 = vor.u32 %v5483_v61, %v4942_v60  ;;  %v5498_v61 = vld [vmem:[#allocation11 + $0x30] sm:$0xff] }
 0x19a   :  { %3070 = vmatpush.bf16.msrb.mxu1 %v4627_v1  ;;  %v5897_v1 = vld [vmem:[#allocation10] sm:$0xf] }
 0x19b   :  { %3080 = vmatpush.bf16.msrb.mxu2 %v4803_v27  ;;  %v2247_v4 = vperm.slane %v5897_v1, 0  ;;  %v5485_v27 = vld [vmem:[#allocation8 + $0x3cc] sm:$0xf] }
 0x19c   :  { %3058 = vmatpush.bf16.msrb.mxu0 %v4483_v22  ;;  %v2066_v13 = vpop.f32.mrf.mxu0  ;;  %v4895_v22 = vor.u32 %v5471_v19, %v4894_v7  ;;  %v4963_v28 = vor.u32 %v5485_v27, %v4960_v8  ;;  %v2250_v19 = vperm.slane %v5897_v1, 3  ;;  %v5501_v8 = vld [vmem:[#allocation11 + $0x48] sm:$0xff] }
 0x19d   :  { %v2067_v34 = vadd.f32 %v2066_v13, %v2054_v35  ;;  %v5477_v13 = vld [vmem:[#allocation8 + $0x38c] sm:$0xf] }
 0x19e   :  { %3071 = vmatpush.bf16.msrb.mxu1 %v4611_v10  ;;  %v2079_v40 = vpop.f32.mrf.mxu1  ;;  %v5467_v10 = vld [vmem:[#allocation8 + $0x334] sm:$0xf0] }
 0x19f   :  { %3059 = vmatmul.bf16.vlgmr.msrb.gmra.mxu0 %v5856_v56  ;;  %3081 = vmatpush.bf16.msrb.mxu2 %v4787_v33  ;;  %v4771_v56 = vor.u32 %v5437_v36, %v4768_v39  ;;  %v2080_v30 = vadd.f32 %v2079_v40, %v2067_v34  ;;  %v4879_v12 = vor.u32 %v5467_v10, %v4878_v9  ;;  %v4944_v33 = vld [vmem:[#allocation8 + $0x3b8] sm:$0xf0]  ;;  %v5473_v40 = vld [vmem:[#allocation8 + $0x36c] sm:$0xf] }
 0x1a0   :  { %v4947_v35 = vor.u32 %v5481_v15, %v4944_v33  ;;  %v4928_v36 = vld [vmem:[#allocation8 + $0x398] sm:$0xf0]  ;;  %v5500_v15 = vld [vmem:[#allocation11 + $0x40] sm:$0xff] }
 0x1a1   :  { %3072 = vmatmul.bf16.vlgmr.msrb.gmra.mxu1 %v5854_v54  ;;  %v4931_v39 = vor.u32 %v5477_v13, %v4928_v36  ;;  %v4912_v34 = vld [vmem:[#allocation8 + $0x378] sm:$0xf0]  ;;  %v5512_v33 = vld [vmem:[#allocation11 + $0xa0] sm:$0xff]  ;;  %v5510_v13 = vld [vmem:[#allocation11 + $0x90] sm:$0xff] }
 0x1a2   :  { %v4915_v24 = vor.u32 %v5473_v40, %v4912_v34  ;;  %3384 = vmatpush.bf16.msra.mxu1 %v5507_v18 }
 0x1a3   :  { %3082 = vmatpush.bf16.msrb.mxu2 %v4771_v56  ;;  %v2248_v56 = vperm.slane %v5897_v1, 1 }
 0x1a4   :  { %v2092_v54 = vpop.f32.mrf.mxu2  ;;  %v2068_v47 = vpop.f32.mrf.mxu0 }
 0x1a5   :  { %v2093_v46 = vadd.f32 %v2092_v54, %v2080_v30  ;;  %v2105_v32 = vpop.f32.mrf.mxu3  ;;  %v5469_v30 = vld [vmem:[#allocation8 + $0x34c] sm:$0xf]  ;;  %v4896_v54 = vld [vmem:[#allocation8 + $0x358] sm:$0xf0] }
 0x1a6   :  { %v2081_v44 = vpop.f32.mrf.mxu1  ;;  %v4899_v47 = vor.u32 %v5469_v30, %v4896_v54  ;;  %v5523_v30 = vld [vmem:[#allocation11 + $0xf8] sm:$0xff] }
 0x1a7   :  { %v2106_v38 = vadd.f32 %v2105_v32, %v2093_v46  ;;  %3083 = vmatpush.bf16.msrb.mxu2 %v4755_v45  ;;  %v4883_v44 = vor.u32 %v5465_v48, %v4880_v49  ;;  %v5520_v49 = vld [vmem:[#allocation11 + $0xe0] sm:$0xff] }
 0x1a9   :  { %v2112_v53 = vmax.f32 %v2106_v38, 0.0 }
 0x1ab   :  { %v5893_v55 = vpack.c.bf16 %v2112_v53, %v2112_v53  ;;  %3084 = vmatpush.bf16.msrb.mxu2 %v4739_v42  ;;  %v4867_v53 = vor.u32 %v5461_v50, %v4864_v51  ;;  %v5519_v50 = vld [vmem:[#allocation11 + $0xd8] sm:$0xff] }
 0x1ac   :  { %v2094_v58 = vpop.f32.mrf.mxu2 }
 0x1ad   :  { %v2107_v59 = vpop.f32.mrf.mxu3  ;;  %2942 = vmatmul.bf16.vlgmr.msra.gmra.mxu3 %v5893_v55 }
 0x1ae   :  { %3038 = vmatpush.bf16.msra.mxu3 %v4975_v31  ;;  %3085 = vmatmul.bf16.vlgmr.msrb.gmra.mxu2 %v5874_v29  ;;  %v2249_v31 = vperm.slane %v5897_v1, 2  ;;  %v5502_v1 = vld [vmem:[#allocation11 + $0x50] sm:$0xff] }
 0x1af   :  { %3397 = vmatpush.bf16.msra.mxu2 %v5515_v41 }
 0x1b2   :  { %3039 = vmatpush.bf16.msra.mxu3 %v4959_v37  ;;  %v5499_v37 = vld [vmem:[#allocation11 + $0x38] sm:$0xff] }
 0x1b3   :  { %3371 = vmatpush.bf16.msra.mxu0 %v5499_v37 }
 0x1b6   :  { %3040 = vmatpush.bf16.msra.mxu3 %v4943_v62 }
 0x1b7   :  { %3372 = vmatpush.bf16.msra.mxu0 %v5498_v61 }
 0x1ba   :  { %3041 = vmatpush.bf16.msra.mxu3 %v4927_v2 }
 0x1bb   :  { %3373 = vmatpush.bf16.msra.mxu0 %v5497_v0 }
 0x1bc   :  { %v2904_v6 = vpop.f32.mrf.mxu0 }
 0x1bd   :  { %v2905_v29 = vadd.f32 %v2904_v6, %v2247_v4  ;;  %2994 = vmatmul.bf16.vlgmr.msrb.gmra.mxu3 %v5893_v55  ;;  %v5494_v6 = vld [vmem:[#allocation11 + $0x10] sm:$0xff] }
 0x1be   :  { %v2917_v26 = vpop.f32.mrf.mxu1  ;;  %3042 = vmatpush.bf16.msra.mxu3 %v4911_v5  ;;  %v5495_v5 = vld [vmem:[#allocation11 + $0x18] sm:$0xff] }
 0x1bf   :  { %v5901_v20 = vadd.f32 %v2917_v26, %v2905_v29  ;;  %3374 = vmatpush.bf16.msra.mxu0 %v5496_v3  ;;  %v5493_v29 = vld [vmem:[#allocation11 + $0x8] sm:$0xff] }
 0x1c0   :  { %v5505_v26 = vld [vmem:[#allocation11 + $0x68] sm:$0xff] }
 0x1c2   :  { %3043 = vmatpush.bf16.msra.mxu3 %v4895_v22 }
 0x1c3   :  { %3375 = vmatpush.bf16.msra.mxu0 %v5495_v5 }
 0x1c4   :  { %v2906_v11 = vpop.f32.mrf.mxu0 }
 0x1c5   :  { %v5504_v11 = vld [vmem:[#allocation11 + $0x60] sm:$0xff] }
 0x1c6   :  { %v2919_v17 = vpop.f32.mrf.mxu1  ;;  %3044 = vmatpush.bf16.msra.mxu3 %v4879_v12  ;;  %v5492_v12 = vld [vmem:[#allocation11] sm:$0xff] }
 0x1c7   :  { %3376 = vmatpush.bf16.msra.mxu0 %v5494_v6  ;;  %v5503_v17 = vld [vmem:[#allocation11 + $0x58] sm:$0xff] }
 0x1ca   :  { %3045 = vmatpush.bf16.msra.mxu3 %v4863_v23  ;;  %v5514_v23 = vld [vmem:[#allocation11 + $0xb0] sm:$0xff] }
 0x1cb   :  { %3377 = vmatpush.bf16.msra.mxu0 %v5493_v29  ;;  %3398 = vmatpush.bf16.msra.mxu2 %v5514_v23  ;;  %v5535_v29 = vld [vmem:[%s5936_s6] ss:$0 sm:$0xff] }
 0x1cd   :  { %3046 = vmatmul.bf16.vlgmr.msra.gmra.mxu3 %v5893_v55 }
 0x1ce   :  { %3090 = vmatpush.bf16.msrb.mxu3 %v4979_v25 }
 0x1cf   :  { %3378 = vmatpush.bf16.msra.mxu0 %v5492_v12 }
 0x1d2   :  { %3091 = vmatpush.bf16.msrb.mxu3 %v4963_v28  ;;  %v5513_v28 = vld [vmem:[#allocation11 + $0xa8] sm:$0xff] }
 0x1d3   :  { %3399 = vmatpush.bf16.msra.mxu2 %v5513_v28 }
 0x1d6   :  { %3092 = vmatpush.bf16.msrb.mxu3 %v4947_v35  ;;  %v5511_v35 = vld [vmem:[#allocation11 + $0x98] sm:$0xff] }
 0x1d7   :  { %3400 = vmatpush.bf16.msra.mxu2 %v5512_v33 }
 0x1da   :  { %3093 = vmatpush.bf16.msrb.mxu3 %v4931_v39  ;;  %v5509_v39 = vld [vmem:[#allocation11 + $0x88] sm:$0xff] }
 0x1db   :  { %3401 = vmatpush.bf16.msra.mxu2 %v5511_v35 }
 0x1dc   :  { %v2956_v43 = vpop.f32.mrf.mxu0 }
 0x1dd   :  { %v2957_v45 = vadd.f32 %v2956_v43, %v2248_v56  ;;  %v5508_v43 = vld [vmem:[#allocation11 + $0x80] sm:$0xff] }
 0x1de   :  { %v2969_v46 = vpop.f32.mrf.mxu1  ;;  %3094 = vmatpush.bf16.msrb.mxu3 %v4915_v24 }
 0x1df   :  { %v5905_v32 = vadd.f32 %v2969_v46, %v2957_v45  ;;  %3402 = vmatpush.bf16.msra.mxu2 %v5510_v13  ;;  %v5522_v45 = vld [vmem:[#allocation11 + $0xf0] sm:$0xff] }
 0x1e2   :  { %3095 = vmatpush.bf16.msrb.mxu3 %v4899_v47  ;;  %v5521_v47 = vld [vmem:[#allocation11 + $0xe8] sm:$0xff] }
 0x1e3   :  { %3403 = vmatpush.bf16.msra.mxu2 %v5509_v39 }
 0x1e4   :  { %v2958_v38 = vpop.f32.mrf.mxu0 }
 0x1e6   :  { %v2971_v42 = vpop.f32.mrf.mxu1  ;;  %3096 = vmatpush.bf16.msrb.mxu3 %v4883_v44 }
 0x1e7   :  { %3404 = vmatpush.bf16.msra.mxu2 %v5508_v43 }
 0x1ea   :  { %3097 = vmatpush.bf16.msrb.mxu3 %v4867_v53  ;;  %v5518_v53 = vld [vmem:[#allocation11 + $0xd0] sm:$0xff] }
 0x1ed   :  { %3098 = vmatmul.bf16.vlgmr.msrb.gmra.mxu3 %v5893_v55  ;;  %v5506_v55 = vld [vmem:[#allocation11 + $0x70] sm:$0xff] }
 0x1ee   :  { %3385 = vmatpush.bf16.msra.mxu1 %v5506_v55  ;;  %3410 = vmatpush.bf16.msra.mxu3 %v5523_v30 }
 0x1f1   :  { %v5909_v52 = vpop.f32.mrf.mxu2 }
 0x1f2   :  { %3386 = vmatpush.bf16.msra.mxu1 %v5505_v26  ;;  %v2931_v36 = vadd.f32 %v5909_v52, %v5901_v20  ;;  %3411 = vmatpush.bf16.msra.mxu3 %v5522_v45  ;;  %v5517_v52 = vld [vmem:[#allocation11 + $0xc8] sm:$0xff] }
 0x1f6   :  { %3387 = vmatpush.bf16.msra.mxu1 %v5504_v11  ;;  %3412 = vmatpush.bf16.msra.mxu3 %v5521_v47 }
 0x1f9   :  { %v2932_v62 = vpop.f32.mrf.mxu2 }
 0x1fa   :  { %3388 = vmatpush.bf16.msra.mxu1 %v5503_v17  ;;  %3413 = vmatpush.bf16.msra.mxu3 %v5520_v49 }
 0x1fc   :  { %v3008_v57 = vpop.f32.mrf.mxu0 }
 0x1fd   :  { %v3009_v58 = vadd.f32 %v3008_v57, %v2249_v31 }
 0x1fe   :  { %v3021_v59 = vpop.f32.mrf.mxu1  ;;  %3389 = vmatpush.bf16.msra.mxu1 %v5502_v1  ;;  %3414 = vmatpush.bf16.msra.mxu3 %v5519_v50 }
 0x1ff   :  { %v5911_v60 = vadd.f32 %v3021_v59, %v3009_v58  ;;  %v5516_v58 = vld [vmem:[#allocation11 + $0xc0] sm:$0xff] }
 0x201   :  { %v5913_v4 = vpop.f32.mrf.mxu2 }
 0x202   :  { %3390 = vmatpush.bf16.msra.mxu1 %v5501_v8  ;;  %v2983_v20 = vadd.f32 %v5913_v4, %v5905_v32  ;;  %3415 = vmatpush.bf16.msra.mxu3 %v5518_v53 }
 0x204   :  { %v3010_v63 = vpop.f32.mrf.mxu0 }
 0x206   :  { %v3023_v2 = vpop.f32.mrf.mxu1  ;;  %3391 = vmatpush.bf16.msra.mxu1 %v5500_v15  ;;  %3416 = vmatpush.bf16.msra.mxu3 %v5517_v52 }
 0x209   :  { %v2984_v7 = vpop.f32.mrf.mxu2 }
 0x20a   :  { %3417 = vmatpush.bf16.msra.mxu3 %v5516_v58 }
 0x211   :  { %v3034_v16 = vpop.f32.mrf.mxu2 }
 0x212   :  { %v3035_v57 = vadd.f32 %v3034_v16, %v5911_v60 }
 0x219   :  { %v3036_v27 = vpop.f32.mrf.mxu2 }
 0x21c   :  { %v3060_v22 = vpop.f32.mrf.mxu0 }
 0x21d   :  { %v3061_v9 = vadd.f32 %v3060_v22, %v2250_v19 }
 0x21e   :  { %v3073_v10 = vpop.f32.mrf.mxu1 }
 0x21f   :  { %v5916_v14 = vadd.f32 %v3073_v10, %v3061_v9 }
 0x224   :  { %v3062_v21 = vpop.f32.mrf.mxu0 }
 0x226   :  { %v3075_v25 = vpop.f32.mrf.mxu1 }
 0x230   :  { %v2943_v40 = vpop.f32.mrf.mxu3 }
 0x231   :  { %v2944_v34 = vadd.f32 %v2943_v40, %v2931_v36  ;;  %v3086_v56 = vpop.f32.mrf.mxu2 }
 0x232   :  { %v3087_v63 = vadd.f32 %v3086_v56, %v5916_v14 }
 0x233   :  { %v3103_v24 = vmax.f32 %v2944_v34, 0.0 }
 0x235   :  { %v3107_v54 = vpack.c.bf16 %v3103_v24, %v3103_v24 }
 0x237   :  { %3379 = vmatmul.bf16.vlgmr.msra.gmra.mxu0 %v3107_v54 }
 0x238   :  { %v2945_v46 = vpop.f32.mrf.mxu3 }
 0x239   :  { %v3088_v48 = vpop.f32.mrf.mxu2 }
 0x240   :  { %v2995_v44 = vpop.f32.mrf.mxu3 }
 0x241   :  { %v2996_v38 = vadd.f32 %v2995_v44, %v2983_v20 }
 0x243   :  { %v3104_v51 = vmax.f32 %v2996_v38, 0.0 }
 0x245   :  { %v3108_v42 = vpack.c.bf16 %v3104_v51, %v3104_v51 }
 0x247   :  { %3392 = vmatmul.bf16.vlgmr.msra.gmra.mxu1 %v3108_v42 }
 0x248   :  { %v2997_v31 = vpop.f32.mrf.mxu3 }
 0x250   :  { %v3047_v59 = vpop.f32.mrf.mxu3 }
 0x251   :  { %v3048_v37 = vadd.f32 %v3047_v59, %v3035_v57 }
 0x253   :  { %v3105_v32 = vmax.f32 %v3048_v37, 0.0 }
 0x255   :  { %v3109_v61 = vpack.c.bf16 %v3105_v32, %v3105_v32 }
 0x257   :  { %3405 = vmatmul.bf16.vlgmr.msra.gmra.mxu2 %v3109_v61 }
 0x258   :  { %v3049_v62 = vpop.f32.mrf.mxu3 }
 0x270   :  { %v3099_v0 = vpop.f32.mrf.mxu3 }
 0x271   :  { %v3100_v2 = vadd.f32 %v3099_v0, %v3087_v63 }
 0x273   :  { %v3106_v18 = vmax.f32 %v3100_v2, 0.0 }
 0x275   :  { %v3110_v55 = vpack.c.bf16 %v3106_v18, %v3106_v18 }
 0x277   :  { %3418 = vmatmul.bf16.vlgmr.msra.gmra.mxu3 %v3110_v55 }
 0x278   :  { %v3101_v3 = vpop.f32.mrf.mxu3 }
 0x2b4   :  { %v3380_v4 = vpop.f32.mrf.mxu0 }
 0x2b5   :  { %v3381_v26 = vadd.f32 %v5535_v29, %v3380_v4 }
 0x2bc   :  { %v3382_v5 = vpop.f32.mrf.mxu0 }
 0x2c4   :  { %v3393_v6 = vpop.f32.mrf.mxu1 }
 0x2c5   :  { %v3394_v22 = vadd.f32 %v3393_v6, %v3381_v26 }
 0x2cc   :  { %v3395_v60 = vpop.f32.mrf.mxu1 }
 0x2da   :  { %v3406_v7 = vpop.f32.mrf.mxu2 }
 0x2db   :  { %v3407_v9 = vadd.f32 %v3406_v7, %v3394_v22 }
 0x2e2   :  { %v3408_v19 = vpop.f32.mrf.mxu2 }
 0x2fa   :  { %v3419_v10 = vpop.f32.mrf.mxu3 }
 0x2fb   :  { %v3420_v12 = vadd.f32 %v3419_v10, %v3407_v9 }
 0x2fd   :  { %3423 = vst [vmem:[#allocation13] sm:$0xff] %v3420_v12 }
 0x2fe   :  { %3434 = dma.vmem_to_hbm [thread:$0]  %s3430_s9, 128, %s3432_s12, [#allocation4]  }
 0x302   :  { %v3421_v11 = vpop.f32.mrf.mxu3 }
 0x303   :  { %5713 = dma.done.wait [#allocation4], 128  }
 0x304   :  { %5714 = vsyncadd [#allocation4], 4294967168 }
 0x305   :  { %3439 = vsyncpa [#allocation3], 1 }
 0x306   :  { %3440 = vsyncpa [#allocation6], 1 }
 0x307   :  { %3441 = vsyncpa [#allocation9], 1 }
 0x308   :  { %3442 = vsyncpa [#allocation12], 1 }
 0x309   :  { %3443 = vsyncpa [#allocation4], 1 }

</bundles_post_ra>
